<compile_context>
chip_gen: v7x
topology: tpu7x:2x2x1
jax: 0.10.0
libtpu: 0.0.40
codegen_flags: <defaults>
</compile_context>

<pallas_src>
import functools

import jax
import jax.numpy as jnp
from jax.experimental import pallas as pl
from jax.experimental.pallas import tpu as pltpu

C_IN = 256
C_MID = 32
L_TILE_MAX = 1024                          # lane-dense tile for the two-pass (huge-L) path
FUSED_BLOCK_BYTES_MAX = 4 * 1024 * 1024    # per-batch x slab budget for the fused path
VMEM_LIMIT = 32 * 1024 * 1024              # safe scoped-VMEM request on v5e/v6e/v7x
_HIGHEST = jax.lax.Precision.HIGHEST


# --------------------------- fused single-pass kernel ---------------------------
def _fused_kernel(x_ref, w1_ref, b1_ref, w2_ref, b2_ref, o_ref):
    """One batch per grid step; x is read from HBM exactly once.

    x_ref : (1, C, L)     w1_ref: (C_MID, C)   b1_ref: (C_MID, 1)
    w2_ref: (C, C_MID)    b2_ref: (C, 1)       o_ref : (1, C, L)
    """
    xf = x_ref[0].astype(jnp.float32)                       # (C, L), channels on sublanes
    pooled = jnp.mean(xf, axis=1, keepdims=True)            # (C, 1) channel means (lane reduce)
    # Column-oriented excite MLP: keeps channels on sublanes end-to-end (no relayouts),
    # f32 all the way with HIGHEST-precision dots.
    h = jnp.dot(w1_ref[...], pooled,
                precision=_HIGHEST, preferred_element_type=jnp.float32)
    h = jnp.maximum(h + b1_ref[...], 0.0)                   # (C_MID, 1)
    s = jnp.dot(w2_ref[...], h,
                precision=_HIGHEST, preferred_element_type=jnp.float32)
    s = jax.nn.sigmoid(s + b2_ref[...])                     # (C, 1)
    o_ref[0] = (xf * s).astype(o_ref.dtype)                 # broadcast over L (lanes)


# --------------------------- two-pass (huge-L) kernels ---------------------------
def _pool_sum_kernel(x_ref, sum_ref, *, l_total):
    """Accumulate per-channel sums over the L (lane) axis.

    x_ref: (1, C, l_tile)   sum_ref: (1, C, 1) f32, resident across the L grid axis.
    """
    li = pl.program_id(1)

    @pl.when(li == 0)
    def _():
        sum_ref[...] = jnp.zeros_like(sum_ref)

    l_tile = x_ref.shape[2]
    x = x_ref[...].astype(jnp.float32)                      # (1, C, l_tile)
    if l_total % l_tile != 0:
        # Mask out-of-range lanes of the (partial) last tile.
        lane = jax.lax.broadcasted_iota(jnp.int32, x.shape, 2)
        valid = (li * l_tile + lane) < l_total
        x = jnp.where(valid, x, 0.0)
    sum_ref[...] += jnp.sum(x, axis=2, keepdims=True)       # (1, C, 1)


def _scale_kernel(x_ref, s_ref, o_ref):
    """out = scale * x, per-channel scale broadcast over the L (lane) axis."""
    o_ref[...] = (x_ref[...] * s_ref[...]).astype(o_ref.dtype)


# ------------------------------------ wrapper ------------------------------------
def squeeze_excitation2(x_ncl, w1, b1, w2, b2, *,
                        max_fused_bytes=FUSED_BLOCK_BYTES_MAX, l_tile=None):
    """x_ncl: (B, 256, L). w1: (32,256,1), b1: (32,), w2: (256,32,1), b2: (256,)."""
    B, C, L = x_ncl.shape
    assert C == C_IN, f"expected {C_IN} channels, got {C}"

    w1_m = w1[:, :, 0].astype(jnp.float32)                  # (C_MID, C_IN)
    w2_m = w2[:, :, 0].astype(jnp.float32)                  # (C_IN, C_MID)

    block_bytes = C * L * x_ncl.dtype.itemsize
    if block_bytes <= max_fused_bytes:
        # -------- fused single pass: 1x read + 1x write of x --------
        b1_c = b1.astype(jnp.float32).reshape(C_MID, 1)
        b2_c = b2.astype(jnp.float32).reshape(C_IN, 1)
        return pl.pallas_call(
            _fused_kernel,
            out_shape=jax.ShapeDtypeStruct((B, C, L), x_ncl.dtype),
            grid=(B,),
            in_specs=[
                pl.BlockSpec((1, C, L), lambda b: (b, 0, 0)),
                pl.BlockSpec((C_MID, C), lambda b: (0, 0)),
                pl.BlockSpec((C_MID, 1), lambda b: (0, 0)),
                pl.BlockSpec((C, C_MID), lambda b: (0, 0)),
                pl.BlockSpec((C, 1), lambda b: (0, 0)),
            ],
            out_specs=pl.BlockSpec((1, C, L), lambda b: (b, 0, 0)),
            compiler_params=pltpu.CompilerParams(
                dimension_semantics=("parallel",),
                vmem_limit_bytes=VMEM_LIMIT),
        )(x_ncl, w1_m, b1_c, w2_m, b2_c)

    # -------- two-pass fallback for very long L --------
    lt = L_TILE_MAX if l_tile is None else l_tile
    lt = min(lt, L)
    n_l = pl.cdiv(L, lt)

    # Pass 1: pooled per-channel sums (B, C, 1); L axis is the reduction axis.
    pooled_sum = pl.pallas_call(
        functools.partial(_pool_sum_kernel, l_total=L),
        out_shape=jax.ShapeDtypeStruct((B, C, 1), jnp.float32),
        grid=(B, n_l),
        in_specs=[pl.BlockSpec((1, C, lt), lambda b, l: (b, 0, l))],
        out_specs=pl.BlockSpec((1, C, 1), lambda b, l: (b, 0, 0)),
        compiler_params=pltpu.CompilerParams(
            dimension_semantics=("parallel", "arbitrary"),
            vmem_limit_bytes=VMEM_LIMIT),
    )(x_ncl)

    # Tiny batched excite MLP for all B at once (negligible; plain XLA).
    pooled = pooled_sum[:, :, 0] / jnp.float32(L)                         # (B, C), true-L mean
    h = jnp.maximum(jnp.dot(pooled, w1_m.T, precision=_HIGHEST) + b1[None, :], 0.0)
    s = jax.nn.sigmoid(jnp.dot(h, w2_m.T, precision=_HIGHEST) + b2[None, :])
    s = s.astype(jnp.float32)[:, :, None]                                 # (B, C, 1)

    # Pass 2: out = scale * x, L-tiled, both grid axes parallel (megacore-friendly).
    return pl.pallas_call(
        _scale_kernel,
        out_shape=jax.ShapeDtypeStruct((B, C, L), x_ncl.dtype),
        grid=(B, n_l),
        in_specs=[
            pl.BlockSpec((1, C, lt), lambda b, l: (b, 0, l)),
            pl.BlockSpec((1, C, 1), lambda b, l: (b, 0, 0)),
        ],
        out_specs=pl.BlockSpec((1, C, lt), lambda b, l: (b, 0, l)),
        compiler_params=pltpu.CompilerParams(
            dimension_semantics=("parallel", "parallel"),
            vmem_limit_bytes=VMEM_LIMIT),
    )(x_ncl, s)


# ------------------------------------ reference ------------------------------------
def _reference(x, w1, b1, w2, b2):
    pooled = jnp.mean(x, axis=2, keepdims=True)                           # (B, C, 1)
    h = jnp.einsum("oc,bcl->bol", w1[:, :, 0], pooled,
                   precision=_HIGHEST) + b1[None, :, None]
    h = jnp.maximum(h, 0.0)
    s = jnp.einsum("oc,bcl->bol", w2[:, :, 0], h,
                   precision=_HIGHEST) + b2[None, :, None]
    return jax.nn.sigmoid(s) * x


if __name__ == "__main__":
    key = jax.random.PRNGKey(0)
    k_x, k_x2, k_w1, k_b1, k_w2, k_b2 = jax.random.split(key, 6)

    # Deterministic parameters (shapes match nn.Conv1d(256,32,1) / nn.Conv1d(32,256,1)).
    w1 = jax.random.normal(k_w1, (C_MID, C_IN, 1), dtype=jnp.float32) * 0.05
    b1 = jax.random.normal(k_b1, (C_MID,), dtype=jnp.float32) * 0.05
    w2 = jax.random.normal(k_w2, (C_IN, C_MID, 1), dtype=jnp.float32) * 0.05
    b2 = jax.random.normal(k_b2, (C_IN,), dtype=jnp.float32) * 0.05

    # Case 1: fused single-pass path, tiny L (full-extent lane block).
    B, L = 2, 16
    x = jax.random.normal(k_x, (B, C_IN, L), dtype=jnp.float32)
    out = jax.block_until_ready(squeeze_excitation2(x, w1, b1, w2, b2))
    ref = _reference(x, w1, b1, w2, b2)
    assert out.shape == (B, C_IN, L)
    assert jnp.allclose(out, ref, atol=1e-4, rtol=1e-4), "mismatch (fused, L=16)"

    # Case 2: fused single-pass path, lane-dense L.
    B2, L2 = 2, 640
    x2 = jax.random.normal(k_x2, (B2, C_IN, L2), dtype=jnp.float32)
    out2 = jax.block_until_ready(squeeze_excitation2(x2, w1, b1, w2, b2))
    ref2 = _reference(x2, w1, b1, w2, b2)
    assert out2.shape == (B2, C_IN, L2)
    assert jnp.allclose(out2, ref2, atol=1e-4, rtol=1e-4), "mismatch (fused, L=640)"

    # Case 3: force the two-pass (huge-L) path with a masked partial last tile.
    out3 = jax.block_until_ready(
        squeeze_excitation2(x2, w1, b1, w2, b2, max_fused_bytes=0, l_tile=512))
    assert jnp.allclose(out3, ref2, atol=1e-4, rtol=1e-4), "mismatch (two-pass, L=640)"

    print("KERNEL_OK")
</pallas_src>

<mosaic_0001>
module attributes {stable_mosaic.version = 11 : i64} {
  func.func @_fused_kernel(%arg0: i32, %arg1: memref<1x256x16xf32, #tpu.memory_space<vmem>>, %arg2: memref<32x256xf32, #tpu.memory_space<vmem>>, %arg3: memref<32x1xf32, #tpu.memory_space<vmem>>, %arg4: memref<256x32xf32, #tpu.memory_space<vmem>>, %arg5: memref<256x1xf32, #tpu.memory_space<vmem>>, %arg6: memref<1x256x16xf32, #tpu.memory_space<vmem>>) attributes {dimension_semantics = [#tpu.dimension_semantics<parallel>], iteration_bounds = array<i64: 2>, scalar_prefetch = 0 : i64, scratch_operands = 0 : i64, tpu.core_type = #tpu.core_type<tc>, window_params = [{transform_indices = @transform_0, window_bounds = array<i64: 1, 256, 16>}, {pipeline_mode = #tpu.pipeline_mode<synchronous>, transform_indices = @transform_1, window_bounds = array<i64: 32, 256>}, {pipeline_mode = #tpu.pipeline_mode<synchronous>, transform_indices = @transform_2, window_bounds = array<i64: 32, 1>}, {pipeline_mode = #tpu.pipeline_mode<synchronous>, transform_indices = @transform_3, window_bounds = array<i64: 256, 32>}, {pipeline_mode = #tpu.pipeline_mode<synchronous>, transform_indices = @transform_4, window_bounds = array<i64: 256, 1>}, {transform_indices = @transform_5, window_bounds = array<i64: 1, 256, 16>}]} {
    %c0 = arith.constant 0 : index
    %c0_0 = arith.constant 0 : index
    %c0_1 = arith.constant 0 : index
    %0 = vector.load %arg1[%c0, %c0_0, %c0_1] : memref<1x256x16xf32, #tpu.memory_space<vmem>>, vector<1x256x16xf32>
    %1 = vector.shape_cast %0 : vector<1x256x16xf32> to vector<256x16xf32>
    %cst = arith.constant dense<0.000000e+00> : vector<256xf32>
    %2 = vector.multi_reduction <add>, %1, %cst [1] : vector<256x16xf32> to vector<256xf32>
    %3 = vector.shape_cast %2 : vector<256xf32> to vector<256x1xf32>
    %cst_2 = arith.constant 1.600000e+01 : f32
    %4 = vector.broadcast %cst_2 : f32 to vector<256x1xf32>
    %5 = arith.divf %3, %4 : vector<256x1xf32>
    %c0_3 = arith.constant 0 : index
    %c0_4 = arith.constant 0 : index
    %6 = vector.load %arg2[%c0_3, %c0_4] : memref<32x256xf32, #tpu.memory_space<vmem>>, vector<32x256xf32>
    %cst_5 = arith.constant dense<0.000000e+00> : vector<32x1xf32>
    %7 = tpu.matmul %6, %5, %cst_5 {dimension_numbers = #tpu.dot_dimension_numbers<[1], [0], [0], [1], [0, 0, 1, 1], [], []>, precision = #tpu.contract_precision<fp32>} : vector<32x256xf32>, vector<256x1xf32>, vector<32x1xf32> -> vector<32x1xf32>
    %c0_6 = arith.constant 0 : index
    %c0_7 = arith.constant 0 : index
    %8 = vector.load %arg3[%c0_6, %c0_7] : memref<32x1xf32, #tpu.memory_space<vmem>>, vector<32x1xf32>
    %9 = arith.addf %7, %8 : vector<32x1xf32>
    %cst_8 = arith.constant 0.000000e+00 : f32
    %10 = vector.broadcast %cst_8 : f32 to vector<32x1xf32>
    %11 = arith.maximumf %9, %10 : vector<32x1xf32>
    %c0_9 = arith.constant 0 : index
    %c0_10 = arith.constant 0 : index
    %12 = vector.load %arg4[%c0_9, %c0_10] : memref<256x32xf32, #tpu.memory_space<vmem>>, vector<256x32xf32>
    %cst_11 = arith.constant dense<0.000000e+00> : vector<256x1xf32>
    %13 = tpu.matmul %12, %11, %cst_11 {dimension_numbers = #tpu.dot_dimension_numbers<[1], [0], [0], [1], [0, 0, 1, 1], [], []>, precision = #tpu.contract_precision<fp32>} : vector<256x32xf32>, vector<32x1xf32>, vector<256x1xf32> -> vector<256x1xf32>
    %c0_12 = arith.constant 0 : index
    %c0_13 = arith.constant 0 : index
    %14 = vector.load %arg5[%c0_12, %c0_13] : memref<256x1xf32, #tpu.memory_space<vmem>>, vector<256x1xf32>
    %15 = arith.addf %13, %14 : vector<256x1xf32>
    %16 = arith.negf %15 : vector<256x1xf32>
    %17 = math.exp %16 : vector<256x1xf32>
    %cst_14 = arith.constant 1.000000e+00 : f32
    %18 = vector.broadcast %cst_14 : f32 to vector<256x1xf32>
    %19 = arith.addf %18, %17 : vector<256x1xf32>
    %20 = arith.divf %18, %19 : vector<256x1xf32>
    %21 = vector.broadcast %20 : vector<256x1xf32> to vector<256x16xf32>
    %22 = arith.mulf %1, %21 : vector<256x16xf32>
    %c0_15 = arith.constant 0 : index
    %c0_16 = arith.constant 0 : index
    %c0_17 = arith.constant 0 : index
    %23 = vector.load %arg6[%c0_15, %c0_16, %c0_17] : memref<1x256x16xf32, #tpu.memory_space<vmem>>, vector<1x256x16xf32>
    %24 = vector.shape_cast %23 : vector<1x256x16xf32> to vector<256x16xf32>
    %25 = vector.shape_cast %22 : vector<256x16xf32> to vector<1x256x16xf32>
    tpu.vector_store %arg6[%c0_15, %c0_16, %c0_17], %25 {strides = array<i32>} : memref<1x256x16xf32, #tpu.memory_space<vmem>>, vector<1x256x16xf32>,
    return
  }
  func.func @transform_0(%arg0: i32) -> (i32, i32, i32) {
    %c0_i32 = arith.constant 0 : i32
    %c0_i32_0 = arith.constant 0 : i32
    %c0_i32_1 = arith.constant 0 : i32
    return %arg0, %c0_i32, %c0_i32_0 : i32, i32, i32
  }
  func.func @transform_1(%arg0: i32) -> (i32, i32) {
    %c0_i32 = arith.constant 0 : i32
    %c0_i32_0 = arith.constant 0 : i32
    %c0_i32_1 = arith.constant 0 : i32
    return %c0_i32, %c0_i32_0 : i32, i32
  }
  func.func @transform_2(%arg0: i32) -> (i32, i32) {
    %c0_i32 = arith.constant 0 : i32
    %c0_i32_0 = arith.constant 0 : i32
    %c0_i32_1 = arith.constant 0 : i32
    return %c0_i32, %c0_i32_0 : i32, i32
  }
  func.func @transform_3(%arg0: i32) -> (i32, i32) {
    %c0_i32 = arith.constant 0 : i32
    %c0_i32_0 = arith.constant 0 : i32
    %c0_i32_1 = arith.constant 0 : i32
    return %c0_i32, %c0_i32_0 : i32, i32
  }
  func.func @transform_4(%arg0: i32) -> (i32, i32) {
    %c0_i32 = arith.constant 0 : i32
    %c0_i32_0 = arith.constant 0 : i32
    %c0_i32_1 = arith.constant 0 : i32
    return %c0_i32, %c0_i32_0 : i32, i32
  }
  func.func @transform_5(%arg0: i32) -> (i32, i32, i32) {
    %c0_i32 = arith.constant 0 : i32
    %c0_i32_0 = arith.constant 0 : i32
    %c0_i32_1 = arith.constant 0 : i32
    return %arg0, %c0_i32, %c0_i32_0 : i32, i32, i32
  }
}

</mosaic_0001>

<bundles_post_ra>
// kernel: tpu_custom_call.1
= control target key start
LH: loop header
LB: loop body
LE: loop exit
PB: predicated region body
PF: predicated region fallthrough
CT: control target
= control target key end

     0   :  { %s5386_s18 = smov 0   ;;  %s6700_s0 = inlined_call_operand.vmem [shape: f32[2,256,16], index: 0, kind: input, shape index: {}]   ;;  %s6701_s1 = inlined_call_operand.vmem [shape: f32[32,256], index: 1, kind: input, shape index: {}]   ;;  %s6702_s2 = inlined_call_operand.vmem [shape: f32[32,1], index: 2, kind: input, shape index: {}]   ;;  %s6703_s3 = inlined_call_operand.vmem [shape: f32[256,32], index: 3, kind: input, shape index: {}]   ;;  %s6704_s4 = inlined_call_operand.vmem [shape: f32[256,1], index: 4, kind: input, shape index: {}]   ;;  %s6705_s5 = inlined_call_operand.vmem [shape: f32[2,256,16], index: 5, kind: output, shape index: {}]  }
   0x1 LB: > { %s3883_s19 = sadd.s32 4294967295, %s5353_s18   ;;  %p3887_p0 = scmp.ge.s32.totalorder %s5353_s18, 1  ;;  %s5353_s18 = sphi %s5386_s18, %s15_s18  }
   0x2   : > { %p187_p1 = scmp.lt.s32.totalorder %s5353_s18, 3 }
   0x4   : > { %p188_p2 = pnand %p3887_p0, %p187_p1 }
   0x6   : > { %191 = sbr.rel (%p188_p2) target bundleno = 1116 (0x45c), region = 40 }
   0xd   : > { %p215_p3 = scmp.lt.s32.totalorder %s3883_s19, 1  ;;  %vm257_vm0 = vcmask 130048   ;;  %vm1497_vm1 = vcmask 261120  }
   0xf   : > { %s6906_s19 = smov (!%p215_p3, %s3883_s19), 1 }
  0x10   : > { %s3926_s20 = sshll.u32 %s6906_s19, 8 }
  0x11   : > { %s5402_s23 = scalar_lea.vmem %s6700_s0, %s3926_s20  ;;  %s6599_s6 = scalar_lea.vmem %s6705_s5, %s3926_s20 }
  0x12   : > { %v241_v0 = vld [vmem:[%s5402_s23 + $0x80] sm:$0xff]  ;;  %v242_v2 = vld [vmem:[%s5402_s23 + $0x88] sm:$0xff]  ;;  %v243_v8 = vld [vmem:[%s5402_s23 + $0x90] sm:$0xff] }
  0x13   : > { %v225_v1 = vld [vmem:[%s5402_s23] sm:$0xff]  ;;  %v306_v3 = vsel %vm257_vm0, %v241_v0, 0.0  ;;  %v226_v5 = vld [vmem:[%s5402_s23 + $0x8] sm:$0xff]  ;;  %v309_v6 = vsel %vm257_vm0, %v242_v2, 0.0  ;;  %v244_v9 = vld [vmem:[%s5402_s23 + $0x98] sm:$0xff]  ;;  %v312_v10 = vsel %vm257_vm0, %v243_v8, 0.0 }
  0x14   : > { %v258_v4 = vsel %vm257_vm0, %v225_v1, 0.0  ;;  %307 = vadd.xlane.f32.xlu0 %v306_v3  ;;  %v261_v7 = vsel %vm257_vm0, %v226_v5, 0.0  ;;  %v315_v11 = vsel %vm257_vm0, %v244_v9, 0.0  ;;  %v227_v12 = vld [vmem:[%s5402_s23 + $0x10] sm:$0xff]  ;;  %v228_v13 = vld [vmem:[%s5402_s23 + $0x18] sm:$0xff]  ;;  %v245_v16 = vld [vmem:[%s5402_s23 + $0xa0] sm:$0xff] }
  0x15   : > { %259 = vadd.xlane.f32.xlu1 %v258_v4  ;;  %v264_v14 = vsel %vm257_vm0, %v227_v12, 0.0  ;;  %v267_v15 = vsel %vm257_vm0, %v228_v13, 0.0  ;;  %v246_v17 = vld [vmem:[%s5402_s23 + $0xa8] sm:$0xff]  ;;  %v318_v18 = vsel %vm257_vm0, %v245_v16, 0.0  ;;  %v229_v20 = vld [vmem:[%s5402_s23 + $0x20] sm:$0xff]  ;;  %v247_v24 = vld [vmem:[%s5402_s23 + $0xb0] sm:$0xff] }
  0x16   : > { %v321_v19 = vsel %vm257_vm0, %v246_v17, 0.0  ;;  %v230_v21 = vld [vmem:[%s5402_s23 + $0x28] sm:$0xff]  ;;  %v270_v22 = vsel %vm257_vm0, %v229_v20, 0.0  ;;  %v248_v25 = vld [vmem:[%s5402_s23 + $0xb8] sm:$0xff]  ;;  %v324_v26 = vsel %vm257_vm0, %v247_v24, 0.0  ;;  %v231_v28 = vld [vmem:[%s5402_s23 + $0x30] sm:$0xff] }
  0x17   : > { %v273_v23 = vsel %vm257_vm0, %v230_v21, 0.0  ;;  %v327_v27 = vsel %vm257_vm0, %v248_v25, 0.0  ;;  %v232_v29 = vld [vmem:[%s5402_s23 + $0x38] sm:$0xff]  ;;  %v276_v30 = vsel %vm257_vm0, %v231_v28, 0.0  ;;  %v249_v32 = vld [vmem:[%s5402_s23 + $0xc0] sm:$0xff]  ;;  %v250_v33 = vld [vmem:[%s5402_s23 + $0xc8] sm:$0xff] }
  0x18   : > { %310 = vadd.xlane.f32.xlu0 %v309_v6  ;;  %v279_v31 = vsel %vm257_vm0, %v232_v29, 0.0  ;;  %v330_v34 = vsel %vm257_vm0, %v249_v32, 0.0  ;;  %v333_v35 = vsel %vm257_vm0, %v250_v33, 0.0  ;;  %v233_v36 = vld [vmem:[%s5402_s23 + $0x40] sm:$0xff]  ;;  %v234_v37 = vld [vmem:[%s5402_s23 + $0x48] sm:$0xff]  ;;  %v251_v40 = vld [vmem:[%s5402_s23 + $0xd0] sm:$0xff] }
  0x19   : > { %262 = vadd.xlane.f32.xlu1 %v261_v7  ;;  %v282_v38 = vsel %vm257_vm0, %v233_v36, 0.0  ;;  %v285_v39 = vsel %vm257_vm0, %v234_v37, 0.0  ;;  %v252_v41 = vld [vmem:[%s5402_s23 + $0xd8] sm:$0xff]  ;;  %v336_v42 = vsel %vm257_vm0, %v251_v40, 0.0  ;;  %v235_v44 = vld [vmem:[%s5402_s23 + $0x50] sm:$0xff]  ;;  %v253_v48 = vld [vmem:[%s5402_s23 + $0xe0] sm:$0xff] }
  0x1a   : > { %v339_v43 = vsel %vm257_vm0, %v252_v41, 0.0  ;;  %v236_v45 = vld [vmem:[%s5402_s23 + $0x58] sm:$0xff]  ;;  %v288_v46 = vsel %vm257_vm0, %v235_v44, 0.0  ;;  %v254_v49 = vld [vmem:[%s5402_s23 + $0xe8] sm:$0xff]  ;;  %v342_v50 = vsel %vm257_vm0, %v253_v48, 0.0  ;;  %v237_v52 = vld [vmem:[%s5402_s23 + $0x60] sm:$0xff] }
  0x1b   : > { %v291_v47 = vsel %vm257_vm0, %v236_v45, 0.0  ;;  %v345_v51 = vsel %vm257_vm0, %v254_v49, 0.0  ;;  %v238_v53 = vld [vmem:[%s5402_s23 + $0x68] sm:$0xff]  ;;  %v294_v54 = vsel %vm257_vm0, %v237_v52, 0.0  ;;  %v255_v56 = vld [vmem:[%s5402_s23 + $0xf0] sm:$0xff]  ;;  %v256_v57 = vld [vmem:[%s5402_s23 + $0xf8] sm:$0xff] }
  0x1c   : > { %313 = vadd.xlane.f32.xlu0 %v312_v10  ;;  %v297_v55 = vsel %vm257_vm0, %v238_v53, 0.0  ;;  %v348_v58 = vsel %vm257_vm0, %v255_v56, 0.0  ;;  %v351_v59 = vsel %vm257_vm0, %v256_v57, 0.0  ;;  %v239_v60 = vld [vmem:[%s5402_s23 + $0x70] sm:$0xff]  ;;  %v240_v61 = vld [vmem:[%s5402_s23 + $0x78] sm:$0xff]  ;;  %v388_v0 = vld [vmem:[%s6701_s1 + $0x8] sm:$0xff] }
  0x1d   : > { %316 = vadd.xlane.f32.xlu1 %v315_v11  ;;  %v300_v62 = vsel %vm257_vm0, %v239_v60, 0.0  ;;  %v303_v63 = vsel %vm257_vm0, %v240_v61, 0.0  ;;  %v5471_v1 = vand.u32 4294901760, %v388_v0  ;;  %v387_v6 = vld [vmem:[%s6701_s1] sm:$0xff]  ;;  %v389_v17 = vld [vmem:[%s6701_s1 + $0x10] sm:$0xff] }
  0x1e   : > { %v5484_v7 = vand.u32 4294901760, %v387_v6 }
  0x1f   : > { %6776 = vst [vmem:[#allocation2_spill] sm:$0xff] %v5471_v1  ;;  %v5474_v2 = vsub.f32 %v388_v0, %v5471_v1  ;;  %781 = vmatprep.mubr.f32.mxu1 %v5471_v1 }
  0x20   : > { %265 = vadd.xlane.f32.xlu0 %v264_v14  ;;  %v5487_v8 = vsub.f32 %v387_v6, %v5484_v7  ;;  %v390_v14 = vld [vmem:[%s6701_s1 + $0x18] sm:$0xff] }
  0x21   : > { %268 = vadd.xlane.f32.xlu1 %v267_v15  ;;  %6777 = vst [vmem:[#allocation3_spill] sm:$0xff] %v5474_v2  ;;  %v6708_v3 = vand.u32 4294901760, %v5474_v2  ;;  %v5501_v21 = vand.u32 4294901760, %v390_v14 }
  0x22   : > { %6778 = vst [vmem:[#allocation4_spill] sm:$0xff] %v5487_v8  ;;  %v6707_v11 = vand.u32 4294901760, %v5487_v8 }
  0x23   : > { %v498_v4 = vsub.f32 %v5474_v2, %v6708_v3 }
  0x24   : > { %319 = vadd.xlane.f32.xlu0 %v318_v18  ;;  %v5499_v20 = vsub.f32 %v5487_v8, %v6707_v11 }
  0x25   : > { %322 = vadd.xlane.f32.xlu1 %v321_v19  ;;  %v499_v5 = vand.u32 4294901760, %v498_v4 }
  0x27   : > { %500 = vmatprep.mubr.f32.mxu0 %v499_v5 }
  0x28   : > { %271 = vadd.xlane.f32.xlu0 %v270_v22 }
  0x29   : > { %274 = vadd.xlane.f32.xlu1 %v273_v23 }
  0x2c   : > { %325 = vadd.xlane.f32.xlu0 %v324_v26  ;;  %v5507_v26 = vand.u32 4294901760, %v389_v17 }
  0x2d   : > { %328 = vadd.xlane.f32.xlu1 %v327_v27 }
  0x30   : > { %277 = vadd.xlane.f32.xlu0 %v276_v30 }
  0x31   : > { %280 = vadd.xlane.f32.xlu1 %v279_v31 }
  0x34   : > { %331 = vadd.xlane.f32.xlu0 %v330_v34  ;;  %v5513_v34 = vsub.f32 %v390_v14, %v5501_v21 }
  0x35   : > { %334 = vadd.xlane.f32.xlu1 %v333_v35 }
  0x36   : > { %6779 = vst [vmem:[#allocation5_spill] sm:$0xff] %v5513_v34  ;;  %v6706_v52 = vand.u32 4294901760, %v5513_v34 }
  0x38   : > { %283 = vadd.xlane.f32.xlu0 %v282_v38 }
  0x39   : > { %286 = vadd.xlane.f32.xlu1 %v285_v39  ;;  %v5522_v39 = vld [vmem:[%s6701_s1 + $0x28] sm:$0xff] }
  0x3a   : > { %v5538_v53 = vand.u32 4294901760, %v5522_v39 }
  0x3c   : > { %337 = vadd.xlane.f32.xlu0 %v336_v42  ;;  %6781 = vst [vmem:[#allocation7_spill] sm:$0xff] %v5538_v53 }
  0x3d   : > { %340 = vadd.xlane.f32.xlu1 %v339_v43  ;;  %v5530_v43 = vsub.f32 %v389_v17, %v5507_v26 }
  0x3f   : > { %6780 = vst [vmem:[#allocation6_spill] sm:$0xff] %v5530_v43 }
  0x40   : > { %289 = vadd.xlane.f32.xlu0 %v288_v46 }
  0x41   : > { %292 = vadd.xlane.f32.xlu1 %v291_v47 }
  0x44   : > { %343 = vadd.xlane.f32.xlu0 %v342_v50 }
  0x45   : > { %346 = vadd.xlane.f32.xlu1 %v345_v51 }
  0x48   : > { %295 = vadd.xlane.f32.xlu0 %v294_v54 }
  0x49   : > { %298 = vadd.xlane.f32.xlu1 %v297_v55 }
  0x4c   : > { %349 = vadd.xlane.f32.xlu0 %v348_v58 }
  0x4d   : > { %352 = vadd.xlane.f32.xlu1 %v351_v59 }
  0x50   : > { %301 = vadd.xlane.f32.xlu0 %v300_v62 }
  0x51   : > { %304 = vadd.xlane.f32.xlu1 %v303_v63 }
  0xa1   : > { %v308_v9 = vpop.xlane.xlu0 %307 }
  0xa2   : > { %v260_v10 = vpop.xlane.xlu1 %259  ;;  %v371_v12 = vmul.f32 0.0625, %v308_v9 }
  0xa3   : > { %v355_v13 = vmul.f32 0.0625, %v260_v10 }
  0xa4   : > { %v448_v15 = vand.u32 4294901760, %v371_v12 }
  0xa5   : > { %v400_v16 = vand.u32 4294901760, %v355_v13  ;;  %v311_v18 = vpop.xlane.xlu0 %310 }
  0xa6   : > { %v263_v19 = vpop.xlane.xlu1 %262  ;;  %v5503_v22 = vsub.f32 %v371_v12, %v448_v15  ;;  %v372_v24 = vmul.f32 0.0625, %v311_v18 }
  0xa7   : > { %v5505_v23 = vsub.f32 %v355_v13, %v400_v16  ;;  %v356_v25 = vmul.f32 0.0625, %v263_v19 }
  0xa8   : > { %v451_v27 = vand.u32 4294901760, %v372_v24  ;;  %v671_v29 = vand.u32 4294901760, %v5503_v22 }
  0xa9   : > { %v403_v28 = vand.u32 4294901760, %v356_v25  ;;  %v559_v30 = vand.u32 4294901760, %v5505_v23  ;;  %v314_v31 = vpop.xlane.xlu0 %313 }
  0xaa   : > { %v317_v32 = vpop.xlane.xlu1 %316  ;;  %v5515_v35 = vsub.f32 %v372_v24, %v451_v27  ;;  %v373_v37 = vmul.f32 0.0625, %v314_v31  ;;  %v5524_v40 = vpack.c.bf16 %v451_v27, %v448_v15  ;;  %v672_v42 = vsub.f32 %v5503_v22, %v671_v29 }
  0xab   : > { %v5517_v36 = vsub.f32 %v356_v25, %v403_v28  ;;  %v374_v38 = vmul.f32 0.0625, %v317_v32  ;;  %v5526_v41 = vpack.c.bf16 %v403_v28, %v400_v16  ;;  %v560_v47 = vsub.f32 %v5505_v23, %v559_v30 }
  0xac   : > { %v454_v44 = vand.u32 4294901760, %v373_v37  ;;  %v678_v46 = vand.u32 4294901760, %v5515_v35  ;;  %4745 = vmatprep.subr.bf16.mxu0 %v5524_v40  ;;  %v673_v50 = vand.u32 4294901760, %v672_v42 }
  0xad   : > { %v457_v45 = vand.u32 4294901760, %v374_v38  ;;  %v266_v48 = vpop.xlane.xlu0 %265  ;;  %v566_v51 = vand.u32 4294901760, %v5517_v36  ;;  %4747 = vmatpush3.bf16.msra.mxu0 %v5526_v41  ;;  %v561_v4 = vand.u32 4294901760, %v560_v47 }
  0xae   : > { %v269_v49 = vpop.xlane.xlu1 %268  ;;  %v5540_v54 = vsub.f32 %v373_v37, %v454_v44  ;;  %v357_v56 = vmul.f32 0.0625, %v266_v48  ;;  %v679_v59 = vsub.f32 %v5515_v35, %v678_v46  ;;  %v5549_v61 = vpack.c.bf16 %v678_v46, %v671_v29 }
  0xaf   : > { %v5542_v55 = vsub.f32 %v374_v38, %v457_v45  ;;  %v358_v57 = vmul.f32 0.0625, %v269_v49  ;;  %v5545_v58 = vpack.c.bf16 %v457_v45, %v454_v44  ;;  %v567_v60 = vsub.f32 %v5517_v36, %v566_v51  ;;  %v5576_v49 = vld [vmem:[%s6701_s1 + $0x20] sm:$0xff] }
  0xb0   : > { %6782 = vst [vmem:[#allocation8_spill] sm:$0xff] %v5549_v61  ;;  %v685_v62 = vand.u32 4294901760, %v5540_v54  ;;  %v406_v63 = vand.u32 4294901760, %v357_v56  ;;  %v680_v10 = vand.u32 4294901760, %v679_v59  ;;  %v5554_v13 = vpack.c.bf16 %v566_v51, %v559_v30 }
  0xb1   : > { %v409_v0 = vand.u32 4294901760, %v358_v57  ;;  %v692_v5 = vand.u32 4294901760, %v5542_v55  ;;  %4749 = vmatprep.subr.bf16.mxu0 %v5545_v58  ;;  %v320_v6 = vpop.xlane.xlu0 %319  ;;  %v568_v12 = vand.u32 4294901760, %v567_v60 }
  0xb2   : > { %v323_v9 = vpop.xlane.xlu1 %322  ;;  %6783 = vst [vmem:[#allocation9_spill] sm:$0xff] %v5554_v13  ;;  %v5556_v14 = vsub.f32 %v357_v56, %v406_v63  ;;  %v375_v16 = vmul.f32 0.0625, %v320_v6  ;;  %v4776_v19 = vpack.c.bf16 %v680_v10, %v673_v50  ;;  %v686_v25 = vsub.f32 %v5540_v54, %v685_v62 }
  0xb3   : > { %v5558_v15 = vsub.f32 %v358_v57, %v409_v0  ;;  %v376_v17 = vmul.f32 0.0625, %v323_v9  ;;  %v5560_v18 = vpack.c.bf16 %v409_v0, %v406_v63  ;;  %v4778_v24 = vpack.c.bf16 %v568_v12, %v561_v4 }
  0xb4   : > { %v573_v27 = vand.u32 4294901760, %v5556_v14  ;;  %v460_v29 = vand.u32 4294901760, %v375_v16  ;;  %4777 = vmatprep.subr.bf16.mxu1 %v4776_v19  ;;  %v687_v38 = vand.u32 4294901760, %v686_v25  ;;  %v693_v42 = vsub.f32 %v5542_v55, %v692_v5 }
  0xb5   : > { %v580_v28 = vand.u32 4294901760, %v5558_v15  ;;  %v463_v31 = vand.u32 4294901760, %v376_v17  ;;  %4751 = vmatpush3.bf16.msra.mxu0 %v5560_v18  ;;  %v272_v32 = vpop.xlane.xlu0 %271  ;;  %v5568_v44 = vpack.c.bf16 %v692_v5, %v685_v62  ;;  %4779 = vmatpush3.bf16.msra.mxu1 %v4778_v24  ;;  %v5587_v10 = vand.u32 4294901760, %v5576_v49 }
  0xb6   : > { %v275_v37 = vpop.xlane.xlu1 %274  ;;  %v5570_v45 = vsub.f32 %v375_v16, %v460_v29  ;;  %v359_v46 = vmul.f32 0.0625, %v272_v32  ;;  %v574_v48 = vsub.f32 %v5556_v14, %v573_v27  ;;  %v694_v56 = vand.u32 4294901760, %v693_v42 }
  0xb7   : > { %6784 = vst [vmem:[#allocation10_spill] sm:$0xff] %v5568_v44  ;;  %v360_v47 = vmul.f32 0.0625, %v275_v37  ;;  %v5578_v50 = vsub.f32 %v376_v17, %v463_v31  ;;  %v5580_v51 = vpack.c.bf16 %v463_v31, %v460_v29  ;;  %v581_v57 = vsub.f32 %v5558_v15, %v580_v28  ;;  %6785 = vst [vmem:[#allocation11_spill] sm:$0xff] %v5587_v10 }
  0xb8   : > { %v699_v59 = vand.u32 4294901760, %v5570_v45  ;;  %v412_v60 = vand.u32 4294901760, %v359_v46  ;;  %v575_v63 = vand.u32 4294901760, %v574_v48  ;;  %v4780_v4 = vpack.c.bf16 %v694_v56, %v687_v38 }
  0xb9   : > { %v415_v62 = vand.u32 4294901760, %v360_v47  ;;  %v706_v0 = vand.u32 4294901760, %v5578_v50  ;;  %4753 = vmatprep.subr.bf16.mxu0 %v5580_v51  ;;  %v326_v5 = vpop.xlane.xlu0 %325  ;;  %v582_v9 = vand.u32 4294901760, %v581_v57  ;;  %v5602_v42 = vsub.f32 %v5513_v34, %v6706_v52 }
  0xba   : > { %v329_v6 = vpop.xlane.xlu1 %328  ;;  %v5589_v12 = vsub.f32 %v359_v46, %v412_v60  ;;  %v377_v17 = vmul.f32 0.0625, %v326_v5  ;;  %4781 = vmatprep.subr.bf16.mxu1 %v4780_v4  ;;  %v700_v29 = vsub.f32 %v5570_v45, %v699_v59 }
  0xbb   : > { %v5591_v16 = vsub.f32 %v360_v47, %v415_v62  ;;  %v378_v19 = vmul.f32 0.0625, %v329_v6  ;;  %v5593_v24 = vpack.c.bf16 %v415_v62, %v412_v60  ;;  %v4782_v25 = vpack.c.bf16 %v582_v9, %v575_v63 }
  0xbc   : > { %v707_v31 = vsub.f32 %v5578_v50, %v706_v0  ;;  %v587_v32 = vand.u32 4294901760, %v5589_v12  ;;  %v466_v38 = vand.u32 4294901760, %v377_v17  ;;  %v701_v56 = vand.u32 4294901760, %v700_v29 }
  0xbd   : > { %6786 = vst [vmem:[#allocation12_spill] sm:$0xff] %v5593_v24  ;;  %v594_v37 = vand.u32 4294901760, %v5591_v16  ;;  %v469_v46 = vand.u32 4294901760, %v378_v19  ;;  %4755 = vmatpush3.bf16.msra.mxu0 %v5593_v24  ;;  %4783 = vmatpush3.bf16.msra.mxu1 %v4782_v25  ;;  %v278_v47 = vpop.xlane.xlu0 %277  ;;  %v5605_v60 = vpack.c.bf16 %v580_v28, %v573_v27 }
  0xbe   : > { %v281_v48 = vpop.xlane.xlu1 %280  ;;  %v708_v57 = vand.u32 4294901760, %v707_v31  ;;  %v5607_v62 = vsub.f32 %v377_v17, %v466_v38  ;;  %v361_v63 = vmul.f32 0.0625, %v278_v47  ;;  %v588_v5 = vsub.f32 %v5589_v12, %v587_v32 }
  0xbf   : > { %6787 = vst [vmem:[#allocation13_spill] sm:$0xff] %v5605_v60  ;;  %v362_v4 = vmul.f32 0.0625, %v281_v48  ;;  %v5610_v6 = vsub.f32 %v378_v19, %v469_v46  ;;  %v5612_v9 = vpack.c.bf16 %v469_v46, %v466_v38  ;;  %v595_v11 = vsub.f32 %v5591_v16, %v594_v37 }
  0xc0   : > { %v4784_v52 = vpack.c.bf16 %v708_v57, %v701_v56  ;;  %v713_v25 = vand.u32 4294901760, %v5607_v62  ;;  %v418_v3 = vand.u32 4294901760, %v361_v63  ;;  %v589_v31 = vand.u32 4294901760, %v588_v5 }
  0xc1   : > { %6788 = vst [vmem:[#allocation14_spill] sm:$0xff] %v5612_v9  ;;  %v421_v29 = vand.u32 4294901760, %v362_v4  ;;  %v720_v27 = vand.u32 4294901760, %v5610_v6  ;;  %4757 = vmatprep.subr.bf16.mxu0 %v5612_v9  ;;  %v332_v28 = vpop.xlane.xlu0 %331  ;;  %v596_v47 = vand.u32 4294901760, %v595_v11  ;;  %v5620_v19 = vsub.f32 %v5522_v39, %v5538_v53 }
  0xc2   : > { %4785 = vmatprep.subr.bf16.mxu1 %v4784_v52  ;;  %v335_v17 = vpop.xlane.xlu1 %334  ;;  %v5622_v38 = vpack.c.bf16 %v706_v0, %v699_v59  ;;  %v5624_v46 = vsub.f32 %v361_v63, %v418_v3  ;;  %v379_v56 = vmul.f32 0.0625, %v332_v28  ;;  %v714_v52 = vsub.f32 %v5607_v62, %v713_v25 }
  0xc3   : > { %v5626_v48 = vsub.f32 %v362_v4, %v421_v29  ;;  %v380_v57 = vmul.f32 0.0625, %v335_v17  ;;  %v5628_v5 = vpack.c.bf16 %v421_v29, %v418_v3  ;;  %v4786_v33 = vpack.c.bf16 %v596_v47, %v589_v31 }
  0xc4   : > { %6789 = vst [vmem:[#allocation15_spill] sm:$0xff] %v5622_v38  ;;  %v721_v30 = vsub.f32 %v5610_v6, %v720_v27  ;;  %v601_v11 = vand.u32 4294901760, %v5624_v46  ;;  %v472_v1 = vand.u32 4294901760, %v379_v56  ;;  %v6791_v59 = vand.u32 4294901760, %v5530_v43 }
  0xc5   : > { %6790 = vst [vmem:[#allocation16_spill] sm:$0xff] %v5628_v5  ;;  %v608_v39 = vand.u32 4294901760, %v5626_v48  ;;  %v475_v63 = vand.u32 4294901760, %v380_v57  ;;  %4759 = vmatpush3.bf16.msra.mxu0 %v5628_v5  ;;  %4787 = vmatpush3.bf16.msra.mxu1 %v4786_v33  ;;  %v284_v3 = vpop.xlane.xlu0 %283  ;;  %v715_v29 = vand.u32 4294901760, %v714_v52  ;;  %v5640_v28 = vpack.c.bf16 %v594_v37, %v587_v32 }
  0xc6   : > { %v5637_v0 = vsub.f32 %v5530_v43, %v6791_v59  ;;  %v287_v4 = vpop.xlane.xlu1 %286  ;;  %v722_v31 = vand.u32 4294901760, %v721_v30  ;;  %v5642_v17 = vsub.f32 %v379_v56, %v472_v1  ;;  %v363_v47 = vmul.f32 0.0625, %v284_v3 }
  0xc7   : > { %6792 = vst [vmem:[#allocation17_spill] sm:$0xff] %v5640_v28  ;;  %v364_v38 = vmul.f32 0.0625, %v287_v4  ;;  %v602_v60 = vsub.f32 %v5624_v46, %v601_v11  ;;  %v5645_v34 = vsub.f32 %v380_v57, %v475_v63  ;;  %v5647_v59 = vpack.c.bf16 %v475_v63, %v472_v1 }
  0xc8   : > { %v4788_v43 = vpack.c.bf16 %v722_v31, %v715_v29  ;;  %v609_v44 = vsub.f32 %v5626_v48, %v608_v39  ;;  %v727_v33 = vand.u32 4294901760, %v5642_v17  ;;  %v424_v13 = vand.u32 4294901760, %v363_v47 }
  0xc9   : > { %6793 = vst [vmem:[#allocation18_spill] sm:$0xff] %v5647_v59  ;;  %v427_v52 = vand.u32 4294901760, %v364_v38  ;;  %v603_v30 = vand.u32 4294901760, %v602_v60  ;;  %v734_v32 = vand.u32 4294901760, %v5645_v34  ;;  %4761 = vmatprep.subr.bf16.mxu0 %v5647_v59  ;;  %v338_v37 = vpop.xlane.xlu0 %337  ;;  %v5655_v1 = vsub.f32 %v5576_v49, %v5587_v10 }
  0xca   : > { %4789 = vmatprep.subr.bf16.mxu1 %v4788_v43  ;;  %v341_v56 = vpop.xlane.xlu1 %340  ;;  %v610_v3 = vand.u32 4294901760, %v609_v44  ;;  %v5657_v57 = vpack.c.bf16 %v720_v27, %v713_v25  ;;  %v5659_v63 = vsub.f32 %v363_v47, %v424_v13  ;;  %v381_v29 = vmul.f32 0.0625, %v338_v37  ;;  %v5679_v25 = vld [vmem:[%s6701_s1 + $0x38] sm:$0xff] }
  0xcb   : > { %v5661_v4 = vsub.f32 %v364_v38, %v427_v52  ;;  %v382_v60 = vmul.f32 0.0625, %v341_v56  ;;  %v5663_v31 = vpack.c.bf16 %v427_v52, %v424_v13  ;;  %v728_v43 = vsub.f32 %v5642_v17, %v727_v33 }
  0xcc   : > { %6794 = vst [vmem:[#allocation19_spill] sm:$0xff] %v5657_v57  ;;  %v4790_v28 = vpack.c.bf16 %v610_v3, %v603_v30  ;;  %v735_v8 = vsub.f32 %v5645_v34, %v734_v32  ;;  %v615_v44 = vand.u32 4294901760, %v5659_v63  ;;  %v478_v61 = vand.u32 4294901760, %v381_v29 }
  0xcd   : > { %6795 = vst [vmem:[#allocation20_spill] sm:$0xff] %v5661_v4  ;;  %6796 = vst [vmem:[#allocation21_spill] sm:$0xff] %v5663_v31  ;;  %v622_v49 = vand.u32 4294901760, %v5661_v4  ;;  %v481_v27 = vand.u32 4294901760, %v382_v60  ;;  %4763 = vmatpush3.bf16.msra.mxu0 %v5663_v31  ;;  %v290_v38 = vpop.xlane.xlu0 %289  ;;  %v729_v13 = vand.u32 4294901760, %v728_v43  ;;  %v5671_v30 = vpack.c.bf16 %v608_v39, %v601_v11 }
  0xce   : > { %4791 = vmatpush3.bf16.msra.mxu1 %v4790_v28  ;;  %v293_v47 = vpop.xlane.xlu1 %292  ;;  %v736_v52 = vand.u32 4294901760, %v735_v8  ;;  %v5673_v37 = vsub.f32 %v381_v29, %v478_v61  ;;  %v365_v56 = vmul.f32 0.0625, %v290_v38  ;;  %v616_v57 = vsub.f32 %v5659_v63, %v615_v44 }
  0xcf   : > { %6797 = vst [vmem:[#allocation22_spill] sm:$0xff] %v5671_v30  ;;  %v366_v3 = vmul.f32 0.0625, %v293_v47  ;;  %v5681_v59 = vsub.f32 %v382_v60, %v481_v27  ;;  %v5683_v28 = vpack.c.bf16 %v481_v27, %v478_v61  ;;  %v623_v8 = vsub.f32 %v5661_v4, %v622_v49 }
  0xd0   : > { %6798 = vst [vmem:[#allocation23_spill] sm:$0xff] %v5673_v37  ;;  %v4792_v31 = vpack.c.bf16 %v736_v52, %v729_v13  ;;  %v741_v11 = vand.u32 4294901760, %v5673_v37  ;;  %v430_v39 = vand.u32 4294901760, %v365_v56  ;;  %v617_v43 = vand.u32 4294901760, %v616_v57 }
  0xd1   : > { %6799 = vst [vmem:[#allocation24_spill] sm:$0xff] %v5681_v59  ;;  %6800 = vst [vmem:[#allocation25_spill] sm:$0xff] %v5683_v28  ;;  %v433_v29 = vand.u32 4294901760, %v366_v3  ;;  %v748_v38 = vand.u32 4294901760, %v5681_v59  ;;  %4765 = vmatprep.subr.bf16.mxu0 %v5683_v28  ;;  %v344_v47 = vpop.xlane.xlu0 %343  ;;  %v624_v5 = vand.u32 4294901760, %v623_v8  ;;  %v5690_v60 = vand.u32 4294901760, %v5679_v25 }
  0xd2   : > { %4793 = vmatprep.subr.bf16.mxu1 %v4792_v31  ;;  %v347_v30 = vpop.xlane.xlu1 %346  ;;  %v5692_v61 = vpack.c.bf16 %v734_v32, %v727_v33  ;;  %v5694_v27 = vsub.f32 %v365_v56, %v430_v39  ;;  %v383_v52 = vmul.f32 0.0625, %v344_v47  ;;  %v742_v28 = vsub.f32 %v5673_v37, %v741_v11  ;;  %v393_v33 = vld [vmem:[%s6701_s1 + $0x30] sm:$0xff] }
  0xd3   : > { %6801 = vst [vmem:[#allocation26_spill] sm:$0xff] %v5690_v60  ;;  %v5696_v13 = vsub.f32 %v366_v3, %v433_v29  ;;  %v384_v9 = vmul.f32 0.0625, %v347_v30  ;;  %v5698_v57 = vpack.c.bf16 %v433_v29, %v430_v39  ;;  %v4794_v24 = vpack.c.bf16 %v624_v5, %v617_v43 }
  0xd4   : > { %6802 = vst [vmem:[#allocation27_spill] sm:$0xff] %v5692_v61  ;;  %6803 = vst [vmem:[#allocation28_spill] sm:$0xff] %v5694_v27  ;;  %v749_v31 = vsub.f32 %v5681_v59, %v748_v38  ;;  %v629_v8 = vand.u32 4294901760, %v5694_v27  ;;  %v484_v2 = vand.u32 4294901760, %v383_v52  ;;  %v743_v3 = vand.u32 4294901760, %v742_v28 }
  0xd5   : > { %6804 = vst [vmem:[#allocation29_spill] sm:$0xff] %v5696_v13  ;;  %6805 = vst [vmem:[#allocation30_spill] sm:$0xff] %v5698_v57  ;;  %v636_v10 = vand.u32 4294901760, %v5696_v13  ;;  %v487_v32 = vand.u32 4294901760, %v384_v9  ;;  %4767 = vmatpush3.bf16.msra.mxu0 %v5698_v57  ;;  %4795 = vmatpush3.bf16.msra.mxu1 %v4794_v24  ;;  %v296_v56 = vpop.xlane.xlu0 %295  ;;  %v5706_v5 = vpack.c.bf16 %v622_v49, %v615_v44 }
  0xd6   : > { %v299_v30 = vpop.xlane.xlu1 %298  ;;  %v750_v39 = vand.u32 4294901760, %v749_v31  ;;  %v5708_v29 = vsub.f32 %v383_v52, %v484_v2  ;;  %v367_v43 = vmul.f32 0.0625, %v296_v56  ;;  %v630_v61 = vsub.f32 %v5694_v27, %v629_v8 }
  0xd7   : > { %6806 = vst [vmem:[#allocation31_spill] sm:$0xff] %v5706_v5  ;;  %v368_v47 = vmul.f32 0.0625, %v299_v30  ;;  %v5714_v59 = vsub.f32 %v384_v9, %v487_v32  ;;  %v5716_v57 = vpack.c.bf16 %v487_v32, %v484_v2  ;;  %v637_v28 = vsub.f32 %v5696_v13, %v636_v10 }
  0xd8   : > { %6807 = vst [vmem:[#allocation32_spill] sm:$0xff] %v5708_v29  ;;  %v4796_v24 = vpack.c.bf16 %v750_v39, %v743_v3  ;;  %v755_v44 = vand.u32 4294901760, %v5708_v29  ;;  %v436_v49 = vand.u32 4294901760, %v367_v43  ;;  %v631_v31 = vand.u32 4294901760, %v630_v61 }
  0xd9   : > { %6808 = vst [vmem:[#allocation33_spill] sm:$0xff] %v5714_v59  ;;  %6809 = vst [vmem:[#allocation34_spill] sm:$0xff] %v5716_v57  ;;  %v439_v52 = vand.u32 4294901760, %v368_v47  ;;  %v762_v56 = vand.u32 4294901760, %v5714_v59  ;;  %4769 = vmatprep.subr.bf16.mxu0 %v5716_v57  ;;  %v350_v30 = vpop.xlane.xlu0 %349  ;;  %v638_v27 = vand.u32 4294901760, %v637_v28  ;;  %v5722_v9 = vand.u32 4294901760, %v393_v33 }
  0xda   : > { %4797 = vmatprep.subr.bf16.mxu1 %v4796_v24  ;;  %v353_v5 = vpop.xlane.xlu1 %352  ;;  %v5724_v2 = vpack.c.bf16 %v748_v38, %v741_v11  ;;  %v5726_v32 = vsub.f32 %v367_v43, %v436_v49  ;;  %v385_v39 = vmul.f32 0.0625, %v350_v30  ;;  %v756_v53 = vsub.f32 %v5708_v29, %v755_v44 }
  0xdb   : > { %v5728_v3 = vsub.f32 %v368_v47, %v439_v52  ;;  %v386_v13 = vmul.f32 0.0625, %v353_v5  ;;  %v5730_v37 = vpack.c.bf16 %v439_v52, %v436_v49  ;;  %v4798_v61 = vpack.c.bf16 %v638_v27, %v631_v31 }
  0xdc   : > { %6810 = vst [vmem:[#allocation35_spill] sm:$0xff] %v5724_v2  ;;  %v763_v24 = vsub.f32 %v5714_v59, %v762_v56  ;;  %v643_v57 = vand.u32 4294901760, %v5726_v32  ;;  %v490_v4 = vand.u32 4294901760, %v385_v39  ;;  %v5738_v11 = vsub.f32 %v5679_v25, %v5690_v60 }
  0xdd   : > { %6811 = vst [vmem:[#allocation36_spill] sm:$0xff] %v5730_v37  ;;  %v650_v28 = vand.u32 4294901760, %v5728_v3  ;;  %v493_v38 = vand.u32 4294901760, %v386_v13  ;;  %4771 = vmatpush3.bf16.msra.mxu0 %v5730_v37  ;;  %4799 = vmatpush3.bf16.msra.mxu1 %v4798_v61  ;;  %v302_v5 = vpop.xlane.xlu0 %301  ;;  %v757_v27 = vand.u32 4294901760, %v756_v53  ;;  %v5741_v49 = vpack.c.bf16 %v636_v10, %v629_v8 }
  0xde   : > { %v305_v43 = vpop.xlane.xlu1 %304  ;;  %v764_v47 = vand.u32 4294901760, %v763_v24  ;;  %v5743_v52 = vsub.f32 %v385_v39, %v490_v4  ;;  %v369_v31 = vmul.f32 0.0625, %v302_v5  ;;  %v644_v2 = vsub.f32 %v5726_v32, %v643_v57 }
  0xdf   : > { %v370_v30 = vmul.f32 0.0625, %v305_v43  ;;  %v5746_v59 = vsub.f32 %v386_v13, %v493_v38  ;;  %v5748_v25 = vpack.c.bf16 %v493_v38, %v490_v4  ;;  %v651_v37 = vsub.f32 %v5728_v3, %v650_v28 }
  0xe0   : > { %v4800_v29 = vpack.c.bf16 %v764_v47, %v757_v27  ;;  %v769_v61 = vand.u32 4294901760, %v5743_v52  ;;  %v442_v60 = vand.u32 4294901760, %v369_v31  ;;  %v645_v24 = vand.u32 4294901760, %v644_v2 }
  0xe1   : > { %v445_v53 = vand.u32 4294901760, %v370_v30  ;;  %v776_v10 = vand.u32 4294901760, %v5746_v59  ;;  %4773 = vmatprep.subr.bf16.mxu0 %v5748_v25  ;;  %v652_v8 = vand.u32 4294901760, %v651_v37  ;;  %v5755_v39 = vsub.f32 %v393_v33, %v5722_v9 }
  0xe2   : > { %4801 = vmatprep.subr.bf16.mxu1 %v4800_v29  ;;  %v5757_v13 = vpack.c.bf16 %v762_v56, %v755_v44  ;;  %v5759_v4 = vsub.f32 %v369_v31, %v442_v60  ;;  %v770_v2 = vsub.f32 %v5743_v52, %v769_v61  ;;  %v4808_v29 = vpack.c.bf16 %v5515_v35, %v5503_v22 }
  0xe3   : > { %v5761_v38 = vsub.f32 %v370_v30, %v445_v53  ;;  %v5763_v5 = vpack.c.bf16 %v445_v53, %v442_v60  ;;  %v4802_v43 = vpack.c.bf16 %v652_v8, %v645_v24  ;;  %v777_v37 = vsub.f32 %v5746_v59, %v776_v10 }
  0xe4   : > { %v5773_v33 = vpack.c.bf16 %v650_v28, %v643_v57  ;;  %v657_v44 = vand.u32 4294901760, %v5759_v4  ;;  %v771_v60 = vand.u32 4294901760, %v770_v2  ;;  %v514_v27 = vand.u32 4294901760, %v5602_v42 }
  0xe5   : > { %v664_v56 = vand.u32 4294901760, %v5761_v38  ;;  %4775 = vmatpush3.bf16.msra.mxu0 %v5763_v5  ;;  %4803 = vmatpush3.bf16.msra.mxu1 %v4802_v43  ;;  %v778_v47 = vand.u32 4294901760, %v777_v37  ;;  %v520_v22 = vand.u32 4294901760, %v5637_v0  ;;  %v6812_v35 = vand.u32 4294901760, %v5620_v19 }
  0xe6   : > { %4809 = vmatprep.subr.bf16.mxu0 %v4808_v29  ;;  %v4810_v57 = vpack.c.bf16 %v5517_v36, %v5505_v23  ;;  %v658_v28 = vsub.f32 %v5759_v4, %v657_v44  ;;  %v542_v30 = vand.u32 4294901760, %v5738_v11  ;;  %v6813_v53 = vand.u32 4294901760, %v5499_v20 }
  0xe7   : > { %v528_v31 = vsub.f32 %v5620_v19, %v6812_v35  ;;  %v665_v42 = vsub.f32 %v5761_v38, %v664_v56  ;;  %v4804_v0 = vpack.c.bf16 %v778_v47, %v771_v60  ;;  %v4812_v24 = vpack.c.bf16 %v5542_v55, %v5540_v54 }
  0xe8   : > { %506 = vmatmul.mubr.f32.vlgmr.msra.gmra.mrb[0].mxu0 %v6813_v53  ;;  %v6814_v8 = vand.u32 4294901760, %v5655_v1  ;;  %v548_v36 = vand.u32 4294901760, %v5755_v39  ;;  %v659_v2 = vand.u32 4294901760, %v658_v28  ;;  %v4814_v20 = vpack.c.bf16 %v5558_v15, %v5556_v14  ;;  %v6824_v28 = vld [vmem:[#allocation29_spill] sm:$0xff]  ;;  %v6825_v53 = vld [vmem:[#allocation26_spill] sm:$0xff] }
  0xe9   : > { %4811 = vmatpush3.bf16.msra.mxu0 %v4810_v57  ;;  %v666_v43 = vand.u32 4294901760, %v665_v42  ;;  %515 = vmatprep.mubr.f32.mxu0 %v514_v27  ;;  %v529_v37 = vand.u32 4294901760, %v528_v31  ;;  %v543_v54 = vsub.f32 %v5738_v11, %v542_v30  ;;  %v4816_v55 = vpack.c.bf16 %v5578_v50, %v5570_v45  ;;  %v6822_v31 = vld [vmem:[#allocation14_spill] sm:$0xff]  ;;  %v6823_v57 = vld [vmem:[#allocation28_spill] sm:$0xff] }
  0xea   : > { %v534_v23 = vsub.f32 %v5655_v1, %v6814_v8  ;;  %4805 = vmatprep.subr.bf16.mxu1 %v4804_v0  ;;  %4813 = vmatprep.subr.bf16.mxu0 %v4812_v24  ;;  %v549_v27 = vsub.f32 %v5755_v39, %v548_v36  ;;  %v4818_v14 = vpack.c.bf16 %v5591_v16, %v5589_v12  ;;  %v6815_v16 = vld [vmem:[#allocation20_spill] sm:$0xff]  ;;  %v6827_v0 = vld [vmem:[#allocation33_spill] sm:$0xff] }
  0xeb   : > { %v4806_v29 = vpack.c.bf16 %v666_v43, %v659_v2  ;;  %v544_v15 = vand.u32 4294901760, %v543_v54  ;;  %v4820_v45 = vpack.c.bf16 %v5610_v6, %v5607_v62  ;;  %v4822_v47 = vpack.c.bf16 %v5626_v48, %v5624_v46  ;;  %v6816_v6 = vld [vmem:[#allocation7_spill] sm:$0xff]  ;;  %v6828_v8 = vld [vmem:[#allocation16_spill] sm:$0xff] }
  0xec   : > { %521 = vmatmul.mubr.f32.gmra.mrb[2].mxu0 %v520_v22  ;;  %v535_v60 = vand.u32 4294901760, %v534_v23  ;;  %v550_v50 = vand.u32 4294901760, %v549_v27  ;;  %v4824_v12 = vpack.c.bf16 %v5645_v34, %v5642_v17  ;;  %v4826_v62 = vpack.c.bf16 %v6815_v16, %v5659_v63  ;;  %v6817_v46 = vld [vmem:[#allocation3_spill] sm:$0xff]  ;;  %v6819_v22 = vld [vmem:[#allocation24_spill] sm:$0xff]  ;;  %v6829_v23 = vld [vmem:[#allocation18_spill] sm:$0xff] }
  0xed   : > { %4807 = vmatpush3.bf16.msra.mxu1 %v4806_v29  ;;  %4815 = vmatpush3.bf16.msra.mxu0 %v4814_v20  ;;  %v6818_v48 = vld [vmem:[#allocation23_spill] sm:$0xff]  ;;  %v6821_v17 = vld [vmem:[#allocation12_spill] sm:$0xff]  ;;  %v4830_v42 = vpack.c.bf16 %v6824_v28, %v6823_v57  ;;  %v4834_v2 = vpack.c.bf16 %v5728_v3, %v5726_v32  ;;  %v6830_v43 = vand.u32 4294901760, %v6817_v46  ;;  %v4836_v20 = vpack.c.bf16 %v5746_v59, %v5743_v52  ;;  %v6831_v29 = vld [vmem:[#allocation21_spill] sm:$0xff] }
  0xee   : > { %4817 = vmatprep.subr.bf16.mxu0 %v4816_v55  ;;  %4841 = vmatprep.subr.bf16.mxu1 %v5524_v40  ;;  %v4828_v35 = vpack.c.bf16 %v6819_v22, %v6818_v48  ;;  %v6820_v34 = vld [vmem:[#allocation11_spill] sm:$0xff]  ;;  %v6826_v63 = vld [vmem:[#allocation32_spill] sm:$0xff]  ;;  %v4838_v54 = vpack.c.bf16 %v5761_v38, %v5759_v4  ;;  %v6833_v55 = vld [vmem:[#allocation30_spill] sm:$0xff]  ;;  %v6853_v57 = vand.u32 4294901760, %v5655_v1 }
  0xef   : > { %530 = vmatprep.mubr.f32.mxu0 %v529_v37  ;;  %v4832_v24 = vpack.c.bf16 %v6827_v0, %v6826_v63  ;;  %v6832_v37 = vld [vmem:[#allocation25_spill] sm:$0xff]  ;;  %v6835_v32 = vld [vmem:[#allocation8_spill] sm:$0xff]  ;;  %v6849_v22 = vld [vmem:[#allocation22_spill] sm:$0xff] }
  0xf0   : > { %783 = vmatmul.mubr.f32.vlgmr.msra.gmra.mrb[0].mxu1 %v5484_v7  ;;  %536 = vmatmul.mubr.f32.gmra.mrb[4].mxu0 %v535_v60  ;;  %v6834_v60 = vld [vmem:[#allocation34_spill] sm:$0xff]  ;;  %v6836_v3 = vld [vmem:[#allocation4_spill] sm:$0xff]  ;;  %v6854_v28 = vld [vmem:[#allocation31_spill] sm:$0xff] }
  0xf1   : > { %4819 = vmatpush3.bf16.msra.mxu0 %v4818_v14  ;;  %4843 = vmatpush3.bf16.msra.mxu1 %v5526_v41  ;;  %v6837_v27 = vld [vmem:[#allocation36_spill] sm:$0xff]  ;;  %v6838_v14 = vld [vmem:[#allocation9_spill] sm:$0xff]  ;;  %v6844_v16 = vand.u32 4294901760, %v6836_v3 }
  0xf2   : > { %4821 = vmatprep.subr.bf16.mxu0 %v4820_v45  ;;  %4845 = vmatprep.subr.bf16.mxu1 %v5545_v58  ;;  %v6840_v45 = vld [vmem:[#allocation5_spill] sm:$0xff] }
  0xf3   : > { %545 = vmatprep.mubr.f32.mxu0 %v544_v15  ;;  %788 = vmatprep.mubr.f32.mxu1 %v5501_v21  ;;  %v6839_v15 = vld [vmem:[#allocation10_spill] sm:$0xff]  ;;  %v6847_v48 = vand.u32 4294901760, %v6840_v45 }
  0xf4   : > { %551 = vmatmul.mubr.f32.gmra.mrb[6].mxu0 %v550_v50  ;;  %790 = vmatmul.mubr.f32.gmra.mrb[2].mxu1 %v5507_v26  ;;  %v6841_v50 = vld [vmem:[#allocation6_spill] sm:$0xff] }
  0xf5   : > { %4823 = vmatpush3.bf16.msra.mxu0 %v4822_v47  ;;  %4847 = vmatpush3.bf16.msra.mxu1 %v5560_v18  ;;  %v6842_v47 = vld [vmem:[#allocation13_spill] sm:$0xff] }
  0xf6   : > { %4825 = vmatprep.subr.bf16.mxu0 %v4824_v12  ;;  %4849 = vmatprep.subr.bf16.mxu1 %v5580_v51  ;;  %v6843_v12 = vld [vmem:[#allocation15_spill] sm:$0xff] }
  0xf7   : > { %795 = vmatprep.mubr.f32.mxu1 %v6816_v6  ;;  %939 = vmatprep.mubr.f32.mxu0 %v6817_v46  ;;  %v6846_v46 = vld [vmem:[#allocation19_spill] sm:$0xff] }
  0xf8   : > { %797 = vmatmul.mubr.f32.gmra.mrb[4].mxu1 %v6820_v34 }
  0xf9   : > { %4827 = vmatpush3.bf16.msra.mxu0 %v4826_v62  ;;  %4851 = vmatpush3.bf16.msra.mxu1 %v6821_v17  ;;  %v6845_v62 = vld [vmem:[#allocation17_spill] sm:$0xff] }
  0xfa   : > { %4829 = vmatprep.subr.bf16.mxu0 %v4828_v35  ;;  %4853 = vmatprep.subr.bf16.mxu1 %v6822_v31  ;;  %v6850_v35 = vld [vmem:[#allocation27_spill] sm:$0xff] }
  0xfb   : > { %802 = vmatprep.mubr.f32.mxu1 %v6825_v53 }
  0xfc   : > { %804 = vmatmul.mubr.f32.gmra.mrb[6].mxu1 %v5722_v9 }
  0xfd   : > { %4831 = vmatpush3.bf16.msra.mxu0 %v4830_v42  ;;  %4855 = vmatpush3.bf16.msra.mxu1 %v6828_v8  ;;  %v6855_v42 = vld [vmem:[#allocation35_spill] sm:$0xff] }
  0xfe   : > { %4833 = vmatprep.subr.bf16.mxu0 %v4832_v24  ;;  %4857 = vmatprep.subr.bf16.mxu1 %v6829_v23 }
  0xff   : > { %1073 = vmatprep.mubr.f32.mxu1 %v6830_v43  ;;  %v398_v43 = vld [vmem:[%s6702_s2 + $0x18] sm:$0xff] }
 0x101   : > { %4835 = vmatpush3.bf16.msra.mxu0 %v4834_v2  ;;  %4859 = vmatpush3.bf16.msra.mxu1 %v6831_v29 }
 0x102   : > { %4837 = vmatprep.subr.bf16.mxu0 %v4836_v20  ;;  %4861 = vmatprep.subr.bf16.mxu1 %v6832_v37 }
 0x105   : > { %4839 = vmatpush3.bf16.msra.mxu0 %v4838_v54  ;;  %4863 = vmatpush3.bf16.msra.mxu1 %v6833_v55 }
 0x106   : > { %4865 = vmatprep.subr.bf16.mxu1 %v6834_v60  ;;  %4873 = vmatprep.subr.bf16.mxu0 %v6835_v32 }
 0x108   : > { %942 = vmatmul.mubr.f32.vlgmr.msra.gmra.mrb[8].mxu0 %v6836_v3 }
 0x109   : > { %4867 = vmatpush3.bf16.msra.mxu1 %v6837_v27  ;;  %4875 = vmatpush3.bf16.msra.mxu0 %v6838_v14 }
 0x10a   : > { %4869 = vmatprep.subr.bf16.mxu1 %v5748_v25  ;;  %4877 = vmatprep.subr.bf16.mxu0 %v6839_v15 }
 0x10b   : > { %948 = vmatprep.mubr.f32.mxu0 %v6840_v45 }
 0x10c   : > { %951 = vmatmul.mubr.f32.gmra.mrb[10].mxu0 %v6841_v50 }
 0x10d   : > { %4871 = vmatpush3.bf16.msra.mxu1 %v5763_v5  ;;  %4879 = vmatpush3.bf16.msra.mxu0 %v6842_v47 }
 0x10e   : > { %4881 = vmatprep.subr.bf16.mxu0 %v6843_v12  ;;  %4905 = vmatprep.subr.bf16.mxu1 %v5524_v40  ;;  %v6848_v40 = vand.u32 4294901760, %v6841_v50 }
 0x10f   : > { %957 = vmatprep.mubr.f32.mxu0 %v5620_v19 }
 0x110   : > { %960 = vmatmul.mubr.f32.gmra.mrb[12].mxu0 %v5655_v1  ;;  %1077 = vmatmul.mubr.f32.vlgmr.msra.gmra.mrb[8].mxu1 %v6844_v16 }
 0x111   : > { %4883 = vmatpush3.bf16.msra.mxu0 %v6845_v62  ;;  %4907 = vmatpush3.bf16.msra.mxu1 %v5526_v41  ;;  %v6851_v41 = vand.u32 4294901760, %v5620_v19 }
 0x112   : > { %4885 = vmatprep.subr.bf16.mxu0 %v6846_v46  ;;  %4909 = vmatprep.subr.bf16.mxu1 %v5545_v58  ;;  %v6852_v58 = vld [vmem:[#allocation2_spill] sm:$0xff] }
 0x113   : > { %966 = vmatprep.mubr.f32.mxu0 %v5738_v11  ;;  %1084 = vmatprep.mubr.f32.mxu1 %v6847_v48 }
 0x114   : > { %969 = vmatmul.mubr.f32.gmra.mrb[14].mxu0 %v5755_v39  ;;  %1088 = vmatmul.mubr.f32.gmra.mrb[10].mxu1 %v6848_v40 }
 0x115   : > { %4887 = vmatpush3.bf16.msra.mxu0 %v6849_v22  ;;  %4911 = vmatpush3.bf16.msra.mxu1 %v5560_v18  ;;  %v4900_v18 = vpack.c.bf16 %v776_v10, %v769_v61  ;;  %v395_v61 = vld [vmem:[%s6702_s2] sm:$0xff] }
 0x116   : > { %4889 = vmatprep.subr.bf16.mxu0 %v6850_v35  ;;  %4913 = vmatprep.subr.bf16.mxu1 %v5580_v51  ;;  %v4902_v51 = vpack.c.bf16 %v664_v56, %v657_v44 }
 0x117   : > { %1095 = vmatprep.mubr.f32.mxu1 %v6851_v41  ;;  %1276 = vmatprep.mubr.f32.mxu0 %v6852_v58 }
 0x118   : > { %1099 = vmatmul.mubr.f32.gmra.mrb[12].mxu1 %v6853_v57 }
 0x119   : > { %4891 = vmatpush3.bf16.msra.mxu0 %v6854_v28  ;;  %4915 = vmatpush3.bf16.msra.mxu1 %v6821_v17 }
 0x11a   : > { %4893 = vmatprep.subr.bf16.mxu0 %v6855_v42  ;;  %4917 = vmatprep.subr.bf16.mxu1 %v6822_v31  ;;  %v397_v31 = vld [vmem:[%s6702_s2 + $0x10] sm:$0xff] }
 0x11b   : > { %1106 = vmatprep.mubr.f32.mxu1 %v542_v30 }
 0x11c   : > { %1110 = vmatmul.mubr.f32.gmra.mrb[14].mxu1 %v548_v36 }
 0x11d   : > { %4895 = vmatpush3.bf16.msra.mxu0 %v5741_v49  ;;  %4919 = vmatpush3.bf16.msra.mxu1 %v6828_v8 }
 0x11e   : > { %4897 = vmatprep.subr.bf16.mxu0 %v5757_v13  ;;  %4921 = vmatprep.subr.bf16.mxu1 %v6829_v23 }
 0x11f   : > { %1401 = vmatprep.mubr.f32.mxu1 %v6852_v58 }
 0x121   : > { %4899 = vmatpush3.bf16.msra.mxu0 %v5773_v33  ;;  %4923 = vmatpush3.bf16.msra.mxu1 %v6831_v29  ;;  %v396_v33 = vld [vmem:[%s6702_s2 + $0x8] sm:$0xff] }
 0x122   : > { %4901 = vmatprep.subr.bf16.mxu0 %v4900_v18  ;;  %4925 = vmatprep.subr.bf16.mxu1 %v6832_v37 }
 0x125   : > { %4903 = vmatpush3.bf16.msra.mxu0 %v4902_v51  ;;  %4927 = vmatpush3.bf16.msra.mxu1 %v6833_v55 }
 0x126   : > { %4929 = vmatprep.subr.bf16.mxu1 %v6834_v60 }
 0x128   : > { %1278 = vmatmul.mubr.f32.vlgmr.msra.gmra.mrb[16].mxu0 %v5484_v7 }
 0x129   : > { %4931 = vmatpush3.bf16.msra.mxu1 %v6837_v27  ;;  %1283 = vmatprep.mubr.f32.mxu0 %v5501_v21 }
 0x12a   : > { %4933 = vmatprep.subr.bf16.mxu1 %v5748_v25 }
 0x12c   : > { %1285 = vmatmul.mubr.f32.gmra.mrb[18].mxu0 %v5507_v26 }
 0x12d   : > { %4935 = vmatpush3.bf16.msra.mxu1 %v5763_v5  ;;  %1290 = vmatprep.mubr.f32.mxu0 %v6816_v6 }
 0x130   : > { %1292 = vmatmul.mubr.f32.gmra.mrb[20].mxu0 %v6820_v34  ;;  %1403 = vmatmul.mubr.f32.vlgmr.msra.gmra.mrb[16].mxu1 %v5484_v7  ;;  %v1433_v7 = vld [vmem:[%s6703_s3] sm:$0xff] }
 0x131   : > { %1297 = vmatprep.mubr.f32.mxu0 %v6825_v53  ;;  %1408 = vmatprep.mubr.f32.mxu1 %v5501_v21  ;;  %v1499_v19 = vsel %vm1497_vm1, %v1433_v7, 0 }
 0x132   : > { %v5937_v21 = vand.u32 4294901760, %v1499_v19 }
 0x134   : > { %1299 = vmatmul.mubr.f32.gmra.mrb[22].mxu0 %v5722_v9  ;;  %1410 = vmatmul.mubr.f32.gmra.mrb[18].mxu1 %v5507_v26  ;;  %v5940_v59 = vsub.f32 %v1499_v19, %v5937_v21 }
 0x135   : > { %1415 = vmatprep.mubr.f32.mxu1 %v6816_v6 }
 0x136   : > { %v1665_v26 = vand.u32 4294901760, %v5940_v59 }
 0x138   : > { %1417 = vmatmul.mubr.f32.gmra.mrb[20].mxu1 %v6820_v34  ;;  %v1666_v1 = vsub.f32 %v5940_v59, %v1665_v26  ;;  %4584 = vmatprep.mubr.f32.mxu0 %v1665_v26 }
 0x139   : > { %1422 = vmatprep.mubr.f32.mxu1 %v6825_v53 }
 0x13a   : > { %v1667_v11 = vand.u32 4294901760, %v1666_v1 }
 0x13c   : > { %1424 = vmatmul.mubr.f32.gmra.mrb[22].mxu1 %v5722_v9 }
 0x13d   : > { %4416 = vmatprep.mubr.f32.mxu1 %v1667_v11 }
 0x1bb   : > { %v3960_v9 = vpop.f32.mrb[0].mxu0 }
 0x1bc   : > { %v3961_v49 = vpop.f32.mrb[1].mxu0 }
 0x1bd   : > { %v3962_v52 = vadd.f32 %v3961_v49, %v3960_v9 }
 0x1bf   : > { %v3963_v25 = vpop.f32.mrb[2].mxu0  ;;  %v508_v13 = vadd.f32 %v3962_v52, %v395_v61 }
 0x1c0   : > { %v3964_v10 = vpop.f32.mrb[3].mxu0 }
 0x1c1   : > { %v3965_v39 = vadd.f32 %v3964_v10, %v3963_v25 }
 0x1c3   : > { %v4004_v4 = vpop.f32.mrb[0].mxu1  ;;  %v3966_v38 = vpop.f32.mrb[4].mxu0  ;;  %v523_v6 = vadd.f32 %v3965_v39, %v396_v33 }
 0x1c4   : > { %v4005_v5 = vpop.f32.mrb[1].mxu1  ;;  %v3967_v44 = vpop.f32.mrb[5].mxu0 }
 0x1c5   : > { %v4006_v56 = vadd.f32 %v4005_v5, %v4004_v4  ;;  %v3968_v30 = vadd.f32 %v3967_v44, %v3966_v38  ;;  %v1434_v4 = vld [vmem:[%s6703_s3 + $0x8] sm:$0xff] }
 0x1c6   : > { %v1502_v44 = vsel %vm1497_vm1, %v1434_v4, 0  ;;  %v1441_v4 = vld [vmem:[%s6703_s3 + $0x40] sm:$0xff] }
 0x1c7   : > { %v785_v36 = vadd.f32 %v4006_v56, %v508_v13  ;;  %v4007_v34 = vpop.f32.mrb[2].mxu1  ;;  %v3969_v17 = vpop.f32.mrb[6].mxu0  ;;  %v538_v8 = vadd.f32 %v3968_v30, %v397_v31 }
 0x1c8   : > { %v4008_v53 = vpop.f32.mrb[3].mxu1  ;;  %v3970_v63 = vpop.f32.mrb[7].mxu0 }
 0x1c9   : > { %v4009_v0 = vadd.f32 %v4008_v53, %v4007_v34  ;;  %v3971_v24 = vadd.f32 %v3970_v63, %v3969_v17 }
 0x1cb   : > { %v792_v23 = vadd.f32 %v4009_v0, %v523_v6  ;;  %v4010_v2 = vpop.f32.mrb[4].mxu1  ;;  %v553_v37 = vadd.f32 %v3971_v24, %v398_v43  ;;  %v1435_v6 = vld [vmem:[%s6703_s3 + $0x10] sm:$0xff]  ;;  %v1436_v0 = vld [vmem:[%s6703_s3 + $0x18] sm:$0xff] }
 0x1cc   : > { %v4011_v20 = vpop.f32.mrb[5].mxu1 }
 0x1cd   : > { %v4012_v29 = vadd.f32 %v4011_v20, %v4010_v2 }
 0x1cf   : > { %v799_v54 = vadd.f32 %v4012_v29, %v538_v8  ;;  %v4013_v55 = vpop.f32.mrb[6].mxu1 }
 0x1d0   : > { %v4014_v60 = vpop.f32.mrb[7].mxu1 }
 0x1d1   : > { %v4015_v32 = vadd.f32 %v4014_v60, %v4013_v55 }
 0x1d3   : > { %v806_v3 = vadd.f32 %v4015_v32, %v553_v37 }
 0x1db   : > { %v4048_v27 = vpop.f32.mrb[8].mxu0 }
 0x1dc   : > { %v4049_v14 = vpop.f32.mrb[9].mxu0 }
 0x1dd   : > { %v4050_v15 = vadd.f32 %v4049_v14, %v4048_v27 }
 0x1df   : > { %v944_v45 = vadd.f32 %v4050_v15, %v785_v36  ;;  %v4051_v50 = vpop.f32.mrb[10].mxu0  ;;  %v5960_v36 = vand.u32 4294901760, %v1502_v44  ;;  %v1437_v15 = vld [vmem:[%s6703_s3 + $0x20] sm:$0xff] }
 0x1e0   : > { %v4052_v47 = vpop.f32.mrb[11].mxu0 }
 0x1e1   : > { %v4053_v12 = vadd.f32 %v4052_v47, %v4051_v50  ;;  %v5970_v2 = vsub.f32 %v1502_v44, %v5960_v36  ;;  %v1438_v47 = vld [vmem:[%s6703_s3 + $0x28] sm:$0xff] }
 0x1e3   : > { %v953_v16 = vadd.f32 %v4053_v12, %v792_v23  ;;  %v4054_v62 = vpop.f32.mrb[12].mxu0  ;;  %v4092_v46 = vpop.f32.mrb[8].mxu1  ;;  %v1505_v23 = vsel %vm1497_vm1, %v1435_v6, 0 }
 0x1e4   : > { %v4055_v48 = vpop.f32.mrb[13].mxu0  ;;  %v4093_v40 = vpop.f32.mrb[9].mxu1  ;;  %v5973_v32 = vand.u32 4294901760, %v1505_v23 }
 0x1e5   : > { %v4056_v22 = vadd.f32 %v4055_v48, %v4054_v62  ;;  %v4094_v35 = vadd.f32 %v4093_v40, %v4092_v46 }
 0x1e6   : > { %v5985_v40 = vsub.f32 %v1505_v23, %v5973_v32 }
 0x1e7   : > { %v962_v41 = vadd.f32 %v4056_v22, %v799_v54  ;;  %v1079_v58 = vadd.f32 %v4094_v35, %v944_v45  ;;  %v4057_v57 = vpop.f32.mrb[14].mxu0  ;;  %v4095_v28 = vpop.f32.mrb[10].mxu1  ;;  %v1508_v54 = vsel %vm1497_vm1, %v1436_v0, 0  ;;  %v1675_v45 = vand.u32 4294901760, %v5970_v2 }
 0x1e8   : > { %v4058_v42 = vpop.f32.mrb[15].mxu0  ;;  %v4096_v18 = vpop.f32.mrb[11].mxu1  ;;  %v5979_v50 = vand.u32 4294901760, %v1508_v54  ;;  %6856 = vst [vmem:[#allocation20_spill] sm:$0xff] %v5985_v40  ;;  %v1511_v22 = vsel %vm1497_vm1, %v1437_v15, 0 }
 0x1e9   : > { %v4059_v51 = vadd.f32 %v4058_v42, %v4057_v57  ;;  %v4097_v7 = vadd.f32 %v4096_v18, %v4095_v28  ;;  %v1514_v57 = vsel %vm1497_vm1, %v1438_v47, 0  ;;  %v1439_v28 = vld [vmem:[%s6703_s3 + $0x30] sm:$0xff]  ;;  %v5995_v42 = vsub.f32 %v5970_v2, %v1675_v45 }
 0x1ea   : > { %v5998_v18 = vsub.f32 %v1508_v54, %v5979_v50 }
 0x1eb   : > { %v971_v19 = vadd.f32 %v4059_v51, %v806_v3  ;;  %v1090_v26 = vadd.f32 %v4097_v7, %v953_v16  ;;  %v4098_v1 = vpop.f32.mrb[12].mxu1 }
 0x1ec   : > { %v4099_v11 = vpop.f32.mrb[13].mxu1  ;;  %6857 = vst [vmem:[#allocation7_spill] sm:$0xff] %v5998_v18 }
 0x1ed   : > { %v4100_v9 = vadd.f32 %v4099_v11, %v4098_v1  ;;  %v1440_v1 = vld [vmem:[%s6703_s3 + $0x38] sm:$0xff] }
 0x1ee   : > { %v1520_v44 = vsel %vm1497_vm1, %v1440_v1, 0 }
 0x1ef   : > { %v1101_v49 = vadd.f32 %v4100_v9, %v962_v41  ;;  %v4101_v52 = vpop.f32.mrb[14].mxu1  ;;  %v1685_v9 = vand.u32 4294901760, %v5985_v40 }
 0x1f0   : > { %v4102_v25 = vpop.f32.mrb[15].mxu1 }
 0x1f1   : > { %v4103_v61 = vadd.f32 %v4102_v25, %v4101_v52  ;;  %v6006_v52 = vand.u32 4294901760, %v1514_v57  ;;  %v1517_v25 = vsel %vm1497_vm1, %v1439_v28, 0 }
 0x1f2   : > { %v6035_v0 = vand.u32 4294901760, %v1517_v25 }
 0x1f3   : > { %v1112_v10 = vadd.f32 %v4103_v61, %v971_v19 }
 0x1fb   : > { %v4136_v39 = vpop.f32.mrb[16].mxu0 }
 0x1fc   : > { %v4137_v13 = vpop.f32.mrb[17].mxu0 }
 0x1fd   : > { %v4138_v38 = vadd.f32 %v4137_v13, %v4136_v39 }
 0x1ff   : > { %v1280_v5 = vadd.f32 %v4138_v38, %v1079_v58  ;;  %v4139_v33 = vpop.f32.mrb[18].mxu0 }
 0x200   : > { %v4140_v56 = vpop.f32.mrb[19].mxu0 }
 0x201   : > { %v4141_v30 = vadd.f32 %v4140_v56, %v4139_v33  ;;  %v1695_v33 = vand.u32 4294901760, %v5998_v18 }
 0x203   : > { %v1287_v34 = vadd.f32 %v4141_v30, %v1090_v26  ;;  %v4142_v17 = vpop.f32.mrb[20].mxu0  ;;  %v4180_v31 = vpop.f32.mrb[16].mxu1  ;;  %v1696_v15 = vsub.f32 %v5998_v18, %v1695_v33 }
 0x204   : > { %v4143_v53 = vpop.f32.mrb[21].mxu0  ;;  %v4181_v63 = vpop.f32.mrb[17].mxu1 }
 0x205   : > { %v4144_v24 = vadd.f32 %v4143_v53, %v4142_v17  ;;  %v4182_v8 = vadd.f32 %v4181_v63, %v4180_v31  ;;  %v1442_v17 = vld [vmem:[%s6703_s3 + $0x48] sm:$0xff]  ;;  %v1443_v31 = vld [vmem:[%s6703_s3 + $0x50] sm:$0xff]  ;;  %v6033_v63 = vsub.f32 %v1514_v57, %v6006_v52 }
 0x206   : > { %v1526_v54 = vsel %vm1497_vm1, %v1442_v17, 0 }
 0x207   : > { %v1294_v43 = vadd.f32 %v4144_v24, %v1101_v49  ;;  %v1405_v20 = vadd.f32 %v4182_v8, %v1280_v5  ;;  %v4145_v29 = vpop.f32.mrb[22].mxu0  ;;  %v4183_v37 = vpop.f32.mrb[18].mxu1  ;;  %v6004_v49 = vand.u32 4294901760, %v1511_v22  ;;  %v1677_v5 = vand.u32 4294901760, %v5995_v42  ;;  %6859 = vst [vmem:[#allocation23_spill] sm:$0xff] %v6033_v63 }
 0x208   : > { %v4146_v55 = vpop.f32.mrb[23].mxu0  ;;  %v4184_v60 = vpop.f32.mrb[19].mxu1  ;;  %v1523_v24 = vsel %vm1497_vm1, %v1441_v4, 0  ;;  %v6063_v57 = vand.u32 4294901760, %v1526_v54  ;;  %v1447_v4 = vld [vmem:[%s6703_s3 + $0x70] sm:$0xff] }
 0x209   : > { %v1429_v3 = vmax.f32 %v1405_v20, 0.0  ;;  %v4147_v27 = vadd.f32 %v4146_v55, %v4145_v29  ;;  %v4185_v14 = vadd.f32 %v4184_v60, %v4183_v37  ;;  %v6030_v53 = vsub.f32 %v1511_v22, %v6004_v49 }
 0x20a   : > { %v1686_v29 = vsub.f32 %v5985_v40, %v1685_v9  ;;  %v6041_v37 = vand.u32 4294901760, %v1520_v44  ;;  %v1529_v55 = vsel %vm1497_vm1, %v1443_v31, 0  ;;  %v6096_v17 = vsub.f32 %v1526_v54, %v6063_v57 }
 0x20b   : > { %v1595_v12 = vand.u32 4294901760, %v1429_v3  ;;  %v1301_v16 = vadd.f32 %v4147_v27, %v1112_v10  ;;  %v1412_v62 = vadd.f32 %v4185_v14, %v1287_v34  ;;  %v4186_v46 = vpop.f32.mrb[20].mxu1  ;;  %6858 = vst [vmem:[#allocation3_spill] sm:$0xff] %v6030_v53  ;;  %v1705_v47 = vand.u32 4294901760, %v6030_v53 }
 0x20c   : > { %v4187_v48 = vpop.f32.mrb[21].mxu1  ;;  %v6065_v28 = vand.u32 4294901760, %v1529_v55  ;;  %6863 = vst [vmem:[#allocation14_spill] sm:$0xff] %v6096_v17 }
 0x20d   : > { %v1985_v35 = vsub.f32 %v1429_v3, %v1595_v12  ;;  %v1430_v41 = vmax.f32 %v1412_v62, 0.0  ;;  %v4188_v58 = vadd.f32 %v4187_v48, %v4186_v46  ;;  %v1444_v62 = vld [vmem:[%s6703_s3 + $0x58] sm:$0xff] }
 0x20e   : > { %v6099_v31 = vsub.f32 %v1529_v55, %v6065_v28 }
 0x20f   : > { %v1598_v51 = vand.u32 4294901760, %v1430_v41  ;;  %v1419_v7 = vadd.f32 %v4188_v58, %v1294_v43  ;;  %v4189_v19 = vpop.f32.mrb[22].mxu1  ;;  %v1986_v26 = vand.u32 4294901760, %v1985_v35  ;;  %v6061_v58 = vsub.f32 %v1520_v44, %v6041_v37 }
 0x210   : > { %v4190_v11 = vpop.f32.mrb[23].mxu1  ;;  %6864 = vst [vmem:[#allocation28_spill] sm:$0xff] %v6099_v31 }
 0x211   : > { %v6009_v61 = vpack.c.bf16 %v1598_v51, %v1595_v12  ;;  %v1992_v10 = vsub.f32 %v1430_v41, %v1598_v51  ;;  %v1431_v39 = vmax.f32 %v1419_v7, 0.0  ;;  %v4191_v13 = vadd.f32 %v4190_v11, %v4189_v19  ;;  %6861 = vst [vmem:[#allocation11_spill] sm:$0xff] %v6061_v58  ;;  %v1445_v51 = vld [vmem:[%s6703_s3 + $0x60] sm:$0xff] }
 0x212   : > { %v1987_v38 = vsub.f32 %v1985_v35, %v1986_v26  ;;  %v6050_v12 = vsub.f32 %v1517_v25, %v6035_v0  ;;  %v1687_v41 = vand.u32 4294901760, %v1686_v29  ;;  %v1697_v11 = vand.u32 4294901760, %v1696_v15  ;;  %v1449_v15 = vld [vmem:[%s6703_s3 + $0x80] sm:$0xff] }
 0x213   : > { %v1601_v56 = vand.u32 4294901760, %v1431_v39  ;;  %v1426_v30 = vadd.f32 %v4191_v13, %v1301_v16  ;;  %4937 = vmatprep.subr.bf16.mxu1 %v6009_v61  ;;  %4961 = vmatprep.subr.bf16.mxu0 %v6009_v61  ;;  %v1993_v6 = vand.u32 4294901760, %v1992_v10  ;;  %v6019_v34 = vpack.c.bf16 %v1992_v10, %v1985_v35  ;;  %v1446_v13 = vld [vmem:[%s6703_s3 + $0x68] sm:$0xff] }
 0x214   : > { %4939 = vmatpush3.bf16.msra.mxu1 %v6009_v61  ;;  %4963 = vmatpush3.bf16.msra.mxu0 %v6009_v61  ;;  %v1988_v3 = vand.u32 4294901760, %v1987_v38  ;;  %6860 = vst [vmem:[#allocation24_spill] sm:$0xff] %v6050_v12  ;;  %v6052_v16 = vand.u32 4294901760, %v1523_v24  ;;  %v1715_v35 = vand.u32 4294901760, %v6033_v63  ;;  %v1706_v25 = vsub.f32 %v6030_v53, %v1705_v47 }
 0x215   : > { %v1999_v8 = vsub.f32 %v1431_v39, %v1601_v56  ;;  %v1432_v23 = vmax.f32 %v1426_v30, 0.0  ;;  %v1994_v43 = vsub.f32 %v1992_v10, %v1993_v6  ;;  %v4968_v20 = vpack.c.bf16 %v1993_v6, %v1986_v26 }
 0x216   : > { %v1532_v26 = vsel %vm1497_vm1, %v1444_v62, 0  ;;  %v1725_v10 = vand.u32 4294901760, %v6050_v12  ;;  %v6082_v39 = vsub.f32 %v1523_v24, %v6052_v16  ;;  %v1535_v30 = vsel %vm1497_vm1, %v1445_v51, 0 }
 0x217   : > { %v1604_v60 = vand.u32 4294901760, %v1432_v23  ;;  %v1995_v27 = vand.u32 4294901760, %v1994_v43  ;;  %v2000_v14 = vand.u32 4294901760, %v1999_v8  ;;  %v1735_v6 = vand.u32 4294901760, %v6061_v58 }
 0x218   : > { %6862 = vst [vmem:[#allocation12_spill] sm:$0xff] %v6082_v39  ;;  %v6101_v24 = vand.u32 4294901760, %v1532_v26  ;;  %v1538_v43 = vsel %vm1497_vm1, %v1446_v13, 0  ;;  %v1541_v29 = vsel %vm1497_vm1, %v1447_v4, 0  ;;  %v1726_v54 = vsub.f32 %v6050_v12, %v1725_v10  ;;  %v1451_v4 = vld [vmem:[%s6703_s3 + $0x90] sm:$0xff] }
 0x219   : > { %v6057_v46 = vpack.c.bf16 %v1604_v60, %v1601_v56  ;;  %v2006_v48 = vsub.f32 %v1432_v23, %v1604_v60  ;;  %v4944_v22 = vpack.c.bf16 %v1995_v27, %v1988_v3  ;;  %v2001_v19 = vsub.f32 %v1999_v8, %v2000_v14 }
 0x21a   : > { %v1716_v56 = vsub.f32 %v6033_v63, %v1715_v35  ;;  %v1745_v55 = vand.u32 4294901760, %v6082_v39  ;;  %v6113_v60 = vand.u32 4294901760, %v1535_v30  ;;  %v6121_v3 = vsub.f32 %v1532_v26, %v6101_v24  ;;  %v1450_v26 = vld [vmem:[%s6703_s3 + $0x88] sm:$0xff] }
 0x21b   : > { %4941 = vmatprep.subr.bf16.mxu1 %v6057_v46  ;;  %4965 = vmatprep.subr.bf16.mxu0 %v6057_v46  ;;  %v2007_v7 = vand.u32 4294901760, %v2006_v48  ;;  %v6073_v1 = vpack.c.bf16 %v2006_v48, %v1999_v8  ;;  %v2002_v8 = vand.u32 4294901760, %v2001_v19  ;;  %v6123_v27 = vand.u32 4294901760, %v1538_v43 }
 0x21c   : > { %4943 = vmatpush3.bf16.msra.mxu1 %v6057_v46  ;;  %4967 = vmatpush3.bf16.msra.mxu0 %v6057_v46  ;;  %6865 = vst [vmem:[#allocation29_spill] sm:$0xff] %v6121_v3  ;;  %v1736_v62 = vsub.f32 %v6061_v58, %v1735_v6  ;;  %v1746_v51 = vsub.f32 %v6082_v39, %v1745_v55  ;;  %v1547_v19 = vsel %vm1497_vm1, %v1449_v15, 0 }
 0x21d   : > { %4945 = vmatprep.subr.bf16.mxu1 %v4944_v22  ;;  %4969 = vmatprep.subr.bf16.mxu0 %v4968_v20  ;;  %v4972_v38 = vpack.c.bf16 %v2007_v7, %v2000_v14  ;;  %v2008_v44 = vsub.f32 %v2006_v48, %v2007_v7  ;;  %v6125_v14 = vand.u32 4294901760, %v1541_v29  ;;  %v6751_v48 = vand.u32 4294901760, %v6099_v31 }
 0x21e   : > { %v6142_v7 = vsub.f32 %v1535_v30, %v6113_v60  ;;  %v1747_v30 = vand.u32 4294901760, %v1746_v51 }
 0x21f   : > { %4417 = vmatmul.mubr.f32.vlgmr.msra.gmra.mrb[24].mxu1 %v1677_v5  ;;  %4585 = vmatmul.mubr.f32.vlgmr.msra.gmra.mrb[24].mxu0 %v1675_v45  ;;  %v2009_v23 = vand.u32 4294901760, %v2008_v44  ;;  %v1448_v45 = vld [vmem:[%s6703_s3 + $0x78] sm:$0xff]  ;;  %v1707_v5 = vand.u32 4294901760, %v1706_v25  ;;  %v6155_v25 = vsub.f32 %v1541_v29, %v6125_v14 }
 0x220   : > { %4947 = vmatpush3.bf16.msra.mxu1 %v4944_v22  ;;  %4971 = vmatpush3.bf16.msra.mxu0 %v4968_v20  ;;  %v1717_v20 = vand.u32 4294901760, %v1716_v56  ;;  %v1544_v22 = vsel %vm1497_vm1, %v1448_v45, 0  ;;  %6866 = vst [vmem:[#allocation26_spill] sm:$0xff] %v6142_v7  ;;  %v1766_v56 = vsub.f32 %v6099_v31, %v6751_v48  ;;  %v1452_v29 = vld [vmem:[%s6703_s3 + $0x98] sm:$0xff] }
 0x221   : > { %4973 = vmatprep.subr.bf16.mxu0 %v4972_v38  ;;  %4419 = vmatprep.mubr.f32.mxu1 %v1687_v41  ;;  %v4948_v42 = vpack.c.bf16 %v2009_v23, %v2002_v8  ;;  %v1727_v41 = vand.u32 4294901760, %v1726_v54  ;;  %6868 = vst [vmem:[#allocation33_spill] sm:$0xff] %v6155_v25  ;;  %v6157_v13 = vand.u32 4294901760, %v1544_v22  ;;  %v1785_v8 = vand.u32 4294901760, %v6142_v7 }
 0x222   : > { %4587 = vmatprep.mubr.f32.mxu0 %v1685_v9  ;;  %v1755_v9 = vand.u32 4294901760, %v6096_v17  ;;  %v6171_v23 = vand.u32 4294901760, %v1547_v19  ;;  %v6752_v45 = vand.u32 4294901760, %v6155_v25  ;;  %v1556_v51 = vsel %vm1497_vm1, %v1452_v29, 0 }
 0x223   : > { %4420 = vmatmul.mubr.f32.gmra.mrb[26].mxu1 %v1697_v11  ;;  %4949 = vmatprep.subr.bf16.mxu1 %v4948_v42  ;;  %v6152_v11 = vsub.f32 %v1538_v43, %v6123_v27  ;;  %v1550_v43 = vsel %vm1497_vm1, %v1450_v26, 0  ;;  %v1454_v26 = vld [vmem:[%s6703_s3 + $0xa8] sm:$0xff]  ;;  %v6219_v29 = vand.u32 4294901760, %v1556_v51  ;;  %v6879_v58 = vand.u32 4294901760, %v6155_v25 }
 0x224   : > { %4588 = vmatmul.mubr.f32.gmra.mrb[26].mxu0 %v1695_v33  ;;  %4951 = vmatpush3.bf16.msra.mxu1 %v4948_v42  ;;  %v6750_v33 = vand.u32 4294901760, %v6121_v3  ;;  %v1756_v44 = vsub.f32 %v6096_v17, %v1755_v9  ;;  %v6186_v42 = vsub.f32 %v1544_v22, %v6157_v13  ;;  %v6191_v15 = vand.u32 4294901760, %v1550_v43 }
 0x225   : > { %4975 = vmatpush3.bf16.msra.mxu0 %v4972_v38  ;;  %4953 = vmatprep.subr.bf16.mxu1 %v6019_v34  ;;  %6867 = vst [vmem:[#allocation32_spill] sm:$0xff] %v6152_v11  ;;  %v1737_v38 = vand.u32 4294901760, %v1736_v62  ;;  %v1795_v54 = vand.u32 4294901760, %v6152_v11  ;;  %v1786_v62 = vsub.f32 %v6142_v7, %v1785_v8  ;;  %v6244_v7 = vsub.f32 %v1556_v51, %v6219_v29  ;;  %v1458_v51 = vld [vmem:[%s6703_s3 + $0xc8] sm:$0xff] }
 0x226   : > { %4977 = vmatprep.subr.bf16.mxu0 %v6009_v61  ;;  %4422 = vmatprep.mubr.f32.mxu1 %v1707_v5  ;;  %6869 = vst [vmem:[#allocation16_spill] sm:$0xff] %v6186_v42  ;;  %v1757_v5 = vand.u32 4294901760, %v1756_v44  ;;  %v1806_v44 = vsub.f32 %v6155_v25, %v6752_v45  ;;  %v1574_v39 = vsel %vm1497_vm1, %v1458_v51, 0 }
 0x227   : > { %4590 = vmatprep.mubr.f32.mxu0 %v1705_v47  ;;  %4423 = vmatmul.mubr.f32.gmra.mrb[28].mxu1 %v1717_v20  ;;  %v1553_v47 = vsel %vm1497_vm1, %v1451_v4, 0  ;;  %v1767_v20 = vand.u32 4294901760, %v1766_v56  ;;  %v1455_v4 = vld [vmem:[%s6703_s3 + $0xb0] sm:$0xff]  ;;  %v1815_v56 = vand.u32 4294901760, %v6186_v42  ;;  %6874 = vst [vmem:[#allocation30_spill] sm:$0xff] %v6244_v7 }
 0x228   : > { %4591 = vmatmul.mubr.f32.gmra.mrb[28].mxu0 %v1715_v35  ;;  %4425 = vmatprep.mubr.f32.mxu1 %v1727_v41  ;;  %v1776_v35 = vsub.f32 %v6121_v3, %v6750_v33  ;;  %v6197_v41 = vsub.f32 %v1547_v19, %v6171_v23  ;;  %v6199_v22 = vand.u32 4294901760, %v1553_v47  ;;  %v1796_v19 = vsub.f32 %v6152_v11, %v1795_v54 }
 0x229   : > { %4593 = vmatprep.mubr.f32.mxu0 %v1725_v10  ;;  %v1453_v10 = vld [vmem:[%s6703_s3 + $0xa0] sm:$0xff]  ;;  %v1562_v33 = vsel %vm1497_vm1, %v1454_v26, 0 }
 0x22a   : > { %6870 = vst [vmem:[#allocation18_spill] sm:$0xff] %v6197_v41  ;;  %v6225_v48 = vsub.f32 %v1553_v47, %v6199_v22  ;;  %v6238_v26 = vand.u32 4294901760, %v1562_v33 }
 0x22b   : > { %4426 = vmatmul.mubr.f32.gmra.mrb[30].mxu1 %v1737_v38  ;;  %v1777_v38 = vand.u32 4294901760, %v1776_v35  ;;  %v1787_v35 = vand.u32 4294901760, %v1786_v62  ;;  %v1816_v62 = vsub.f32 %v6186_v42, %v1815_v56 }
 0x22c   : > { %4594 = vmatmul.mubr.f32.gmra.mrb[30].mxu0 %v1735_v6  ;;  %4428 = vmatprep.mubr.f32.mxu1 %v1747_v30  ;;  %v1559_v6 = vsel %vm1497_vm1, %v1453_v10, 0  ;;  %v6217_v30 = vsub.f32 %v1550_v43, %v6191_v15  ;;  %v1825_v10 = vand.u32 4294901760, %v6197_v41  ;;  %6872 = vst [vmem:[#allocation25_spill] sm:$0xff] %v6225_v48  ;;  %v1456_v43 = vld [vmem:[%s6703_s3 + $0xb8] sm:$0xff]  ;;  %v1845_v42 = vand.u32 4294901760, %v6225_v48 }
 0x22d   : > { %4596 = vmatprep.mubr.f32.mxu0 %v1745_v55  ;;  %v1565_v55 = vsel %vm1497_vm1, %v1455_v4, 0  ;;  %v6227_v45 = vand.u32 4294901760, %v1559_v6  ;;  %v1807_v4 = vand.u32 4294901760, %v1806_v44  ;;  %v6259_v44 = vsub.f32 %v1562_v33, %v6238_v26 }
 0x22e   : > { %6871 = vst [vmem:[#allocation21_spill] sm:$0xff] %v6217_v30  ;;  %v6240_v47 = vand.u32 4294901760, %v1565_v55  ;;  %v1835_v11 = vand.u32 4294901760, %v6217_v30 }
 0x22f   : > { %4429 = vmatmul.mubr.f32.gmra.mrb[32].mxu1 %v1757_v5  ;;  %v6873_v5 = vand.u32 4294901760, %v6099_v31  ;;  %v6875_v31 = vand.u32 4294901760, %v6121_v3  ;;  %v6252_v17 = vsub.f32 %v1559_v6, %v6227_v45  ;;  %6877 = vst [vmem:[#allocation8_spill] sm:$0xff] %v6259_v44  ;;  %v1459_v6 = vld [vmem:[%s6703_s3 + $0xd0] sm:$0xff] }
 0x230   : > { %4597 = vmatmul.mubr.f32.gmra.mrb[32].mxu0 %v1755_v9  ;;  %4431 = vmatprep.mubr.f32.mxu1 %v1767_v20  ;;  %v1457_v9 = vld [vmem:[%s6703_s3 + $0xc0] sm:$0xff]  ;;  %v1797_v20 = vand.u32 4294901760, %v1796_v19  ;;  %v1826_v19 = vsub.f32 %v6197_v41, %v1825_v10 }
 0x231   : > { %4599 = vmatprep.mubr.f32.mxu0 %v6873_v5  ;;  %v1568_v5 = vsel %vm1497_vm1, %v1456_v43, 0  ;;  %6876 = vst [vmem:[#allocation34_spill] sm:$0xff] %v6252_v17  ;;  %v1817_v43 = vand.u32 4294901760, %v1816_v62  ;;  %v1865_v3 = vand.u32 4294901760, %v6252_v17  ;;  %v1460_v62 = vld [vmem:[%s6703_s3 + $0xd8] sm:$0xff] }
 0x232   : > { %v1827_v33 = vand.u32 4294901760, %v1826_v19  ;;  %v1461_v19 = vld [vmem:[%s6703_s3 + $0xe0] sm:$0xff]  ;;  %v1580_v63 = vsel %vm1497_vm1, %v1460_v62, 0 }
 0x233   : > { %4432 = vmatmul.mubr.f32.gmra.mrb[34].mxu1 %v1777_v38  ;;  %v1571_v38 = vsel %vm1497_vm1, %v1457_v9, 0  ;;  %v1855_v9 = vand.u32 4294901760, %v6244_v7  ;;  %v1866_v12 = vsub.f32 %v6252_v17, %v1865_v3 }
 0x234   : > { %4600 = vmatmul.mubr.f32.gmra.mrb[34].mxu0 %v6875_v31  ;;  %4434 = vmatprep.mubr.f32.mxu1 %v1787_v35  ;;  %v6262_v31 = vsub.f32 %v1565_v55, %v6240_v47  ;;  %v6264_v35 = vand.u32 4294901760, %v1568_v5  ;;  %v6271_v41 = vand.u32 4294901760, %v1571_v38  ;;  %v1846_v55 = vsub.f32 %v6225_v48, %v1845_v42 }
 0x235   : > { %4602 = vmatprep.mubr.f32.mxu0 %v1785_v8  ;;  %v1836_v8 = vsub.f32 %v6217_v30, %v1835_v11  ;;  %v1875_v30 = vand.u32 4294901760, %v6259_v44  ;;  %v6294_v48 = vand.u32 4294901760, %v1574_v39 }
 0x236   : > { %6878 = vst [vmem:[#allocation4_spill] sm:$0xff] %v6262_v31  ;;  %v1847_v25 = vand.u32 4294901760, %v1846_v55 }
 0x237   : > { %4435 = vmatmul.mubr.f32.gmra.mrb[36].mxu1 %v1797_v20  ;;  %v1577_v20 = vsel %vm1497_vm1, %v1459_v6, 0  ;;  %v1837_v51 = vand.u32 4294901760, %v1836_v8  ;;  %v6292_v6 = vsub.f32 %v1571_v38, %v6271_v41  ;;  %v1462_v8 = vld [vmem:[%s6703_s3 + $0xe8] sm:$0xff]  ;;  %v1876_v38 = vsub.f32 %v6259_v44, %v1875_v30 }
 0x238   : > { %4603 = vmatmul.mubr.f32.gmra.mrb[36].mxu0 %v1795_v54  ;;  %4437 = vmatprep.mubr.f32.mxu1 %v1807_v4  ;;  %v1885_v54 = vand.u32 4294901760, %v6262_v31  ;;  %v6285_v4 = vsub.f32 %v1568_v5, %v6264_v35  ;;  %v6297_v5 = vand.u32 4294901760, %v1577_v20  ;;  %v6312_v62 = vsub.f32 %v1574_v39, %v6294_v48  ;;  %v1464_v39 = vld [vmem:[%s6703_s3 + $0xf8] sm:$0xff] }
 0x239   : > { %4605 = vmatprep.mubr.f32.mxu0 %v6879_v58  ;;  %v1856_v58 = vsub.f32 %v6244_v7, %v1855_v9  ;;  %6881 = vst [vmem:[#allocation9_spill] sm:$0xff] %v6292_v6  ;;  %v1867_v44 = vand.u32 4294901760, %v1866_v12  ;;  %v1586_v53 = vsel %vm1497_vm1, %v1462_v8, 0 }
 0x23a   : > { %6880 = vst [vmem:[#allocation36_spill] sm:$0xff] %v6285_v4  ;;  %v1886_v7 = vsub.f32 %v6262_v31, %v1885_v54  ;;  %v6317_v31 = vsub.f32 %v1577_v20, %v6297_v5  ;;  %v6332_v8 = vand.u32 4294901760, %v1586_v53 }
 0x23b   : > { %4438 = vmatmul.mubr.f32.gmra.mrb[38].mxu1 %v1817_v43  ;;  %v1583_v43 = vsel %vm1497_vm1, %v1461_v19, 0  ;;  %v1857_v55 = vand.u32 4294901760, %v1856_v58  ;;  %v6314_v19 = vand.u32 4294901760, %v1580_v63  ;;  %v1877_v58 = vand.u32 4294901760, %v1876_v38 }
 0x23c   : > { %4606 = vmatmul.mubr.f32.gmra.mrb[38].mxu0 %v1815_v56  ;;  %4440 = vmatprep.mubr.f32.mxu1 %v1827_v33  ;;  %v1895_v56 = vand.u32 4294901760, %v6285_v4  ;;  %v1463_v33 = vld [vmem:[%s6703_s3 + $0xf0] sm:$0xff]  ;;  %v6319_v17 = vand.u32 4294901760, %v1583_v43  ;;  %v1887_v18 = vand.u32 4294901760, %v1886_v7  ;;  %v1592_v38 = vsel %vm1497_vm1, %v1464_v39, 0 }
 0x23d   : > { %4608 = vmatprep.mubr.f32.mxu0 %v1825_v10  ;;  %v1905_v10 = vand.u32 4294901760, %v6292_v6  ;;  %v6330_v20 = vsub.f32 %v1580_v63, %v6314_v19 }
 0x23f   : > { %4441 = vmatmul.mubr.f32.gmra.mrb[40].mxu1 %v1837_v51  ;;  %v1589_v51 = vsel %vm1497_vm1, %v1463_v33, 0  ;;  %v1906_v12 = vsub.f32 %v6292_v6, %v1905_v10  ;;  %v6336_v33 = vsub.f32 %v1583_v43, %v6319_v17  ;;  %v1935_v63 = vand.u32 4294901760, %v6330_v20 }
 0x240   : > { %4609 = vmatmul.mubr.f32.gmra.mrb[40].mxu0 %v1835_v11  ;;  %4443 = vmatprep.mubr.f32.mxu1 %v1847_v25  ;;  %v1896_v11 = vsub.f32 %v6285_v4, %v1895_v56  ;;  %v1915_v25 = vand.u32 4294901760, %v6312_v62  ;;  %v6338_v7 = vand.u32 4294901760, %v1589_v51  ;;  %v6344_v4 = vsub.f32 %v1586_v53, %v6332_v8 }
 0x241   : > { %4611 = vmatprep.mubr.f32.mxu0 %v1845_v42  ;;  %v1925_v42 = vand.u32 4294901760, %v6317_v31  ;;  %v1945_v40 = vand.u32 4294901760, %v6336_v33 }
 0x242   : > { %v1916_v6 = vsub.f32 %v6312_v62, %v1915_v25  ;;  %v1955_v53 = vand.u32 4294901760, %v6344_v4 }
 0x243   : > { %4444 = vmatmul.mubr.f32.gmra.mrb[42].mxu1 %v1857_v55  ;;  %v1897_v55 = vand.u32 4294901760, %v1896_v11  ;;  %v1926_v43 = vsub.f32 %v6317_v31, %v1925_v42 }
 0x244   : > { %4612 = vmatmul.mubr.f32.gmra.mrb[42].mxu0 %v1855_v9  ;;  %4446 = vmatprep.mubr.f32.mxu1 %v1867_v44  ;;  %v6346_v44 = vand.u32 4294901760, %v1592_v38  ;;  %v1907_v9 = vand.u32 4294901760, %v1906_v12  ;;  %v1917_v39 = vand.u32 4294901760, %v1916_v6 }
 0x245   : > { %4614 = vmatprep.mubr.f32.mxu0 %v1865_v3  ;;  %v6351_v3 = vsub.f32 %v1589_v51, %v6338_v7 }
 0x246   : > { %v6356_v11 = vsub.f32 %v1592_v38, %v6346_v44 }
 0x247   : > { %4447 = vmatmul.mubr.f32.gmra.mrb[44].mxu1 %v1877_v58  ;;  %v1936_v58 = vsub.f32 %v6330_v20, %v1935_v63  ;;  %v1965_v12 = vand.u32 4294901760, %v6351_v3 }
 0x248   : > { %4615 = vmatmul.mubr.f32.gmra.mrb[44].mxu0 %v1875_v30  ;;  %4449 = vmatprep.mubr.f32.mxu1 %v1887_v18  ;;  %v1927_v18 = vand.u32 4294901760, %v1926_v43  ;;  %v1946_v30 = vsub.f32 %v6336_v33, %v1945_v40  ;;  %v1975_v6 = vand.u32 4294901760, %v6356_v11 }
 0x249   : > { %4617 = vmatprep.mubr.f32.mxu0 %v1885_v54  ;;  %v1937_v51 = vand.u32 4294901760, %v1936_v58  ;;  %v1956_v54 = vsub.f32 %v6344_v4, %v1955_v53  ;;  %v1966_v38 = vsub.f32 %v6351_v3, %v1965_v12 }
 0x24b   : > { %4450 = vmatmul.mubr.f32.gmra.mrb[46].mxu1 %v1897_v55  ;;  %v1947_v55 = vand.u32 4294901760, %v1946_v30  ;;  %v1967_v43 = vand.u32 4294901760, %v1966_v38 }
 0x24c   : > { %4618 = vmatmul.mubr.f32.gmra.mrb[46].mxu0 %v1895_v56  ;;  %4452 = vmatprep.mubr.f32.mxu1 %v1907_v9  ;;  %v1957_v56 = vand.u32 4294901760, %v1956_v54  ;;  %v1976_v9 = vsub.f32 %v6356_v11, %v1975_v6  ;;  %v1472_v54 = vld [vmem:[%s6704_s4 + $0x38] sm:$0xff] }
 0x24d   : > { %4620 = vmatprep.mubr.f32.mxu0 %v1905_v10 }
 0x24e   : > { %v1977_v10 = vand.u32 4294901760, %v1976_v9 }
 0x24f   : > { %4453 = vmatmul.mubr.f32.gmra.mrb[48].mxu1 %v1917_v39 }
 0x250   : > { %4621 = vmatmul.mubr.f32.gmra.mrb[48].mxu0 %v1915_v25  ;;  %4455 = vmatprep.mubr.f32.mxu1 %v1927_v18 }
 0x251   : > { %4623 = vmatprep.mubr.f32.mxu0 %v1925_v42 }
 0x253   : > { %4456 = vmatmul.mubr.f32.gmra.mrb[50].mxu1 %v1937_v51 }
 0x254   : > { %4624 = vmatmul.mubr.f32.gmra.mrb[50].mxu0 %v1935_v63  ;;  %4458 = vmatprep.mubr.f32.mxu1 %v1947_v55  ;;  %v1471_v55 = vld [vmem:[%s6704_s4 + $0x30] sm:$0xff] }
 0x255   : > { %4626 = vmatprep.mubr.f32.mxu0 %v1945_v40  ;;  %v6882_v40 = vld [vmem:[#allocation20_spill] sm:$0xff] }
 0x257   : > { %4459 = vmatmul.mubr.f32.gmra.mrb[52].mxu1 %v1957_v56 }
 0x258   : > { %4627 = vmatmul.mubr.f32.gmra.mrb[52].mxu0 %v1955_v53  ;;  %4461 = vmatprep.mubr.f32.mxu1 %v1967_v43 }
 0x259   : > { %4629 = vmatprep.mubr.f32.mxu0 %v1965_v12 }
 0x25b   : > { %4462 = vmatmul.mubr.f32.gmra.mrb[54].mxu1 %v1977_v10 }
 0x25c   : > { %4630 = vmatmul.mubr.f32.gmra.mrb[54].mxu0 %v1975_v6  ;;  %4472 = vmatprep.mubr.f32.mxu1 %v5937_v21 }
 0x25d   : > { %4640 = vmatprep.mubr.f32.mxu0 %v5937_v21 }
 0x25f   : > { %4473 = vmatmul.mubr.f32.vlgmr.msra.gmra.mrb[24].mxu1 %v5960_v36 }
 0x260   : > { %4955 = vmatpush3.bf16.msra.mxu1 %v6019_v34  ;;  %4641 = vmatmul.mubr.f32.vlgmr.msra.gmra.mrb[24].mxu0 %v5960_v36  ;;  %v6884_v34 = vld [vmem:[#allocation3_spill] sm:$0xff] }
 0x261   : > { %4979 = vmatpush3.bf16.msra.mxu0 %v6009_v61  ;;  %4957 = vmatprep.subr.bf16.mxu1 %v6073_v1  ;;  %v6883_v61 = vld [vmem:[#allocation7_spill] sm:$0xff] }
 0x262   : > { %4981 = vmatprep.subr.bf16.mxu0 %v6057_v46  ;;  %4475 = vmatprep.mubr.f32.mxu1 %v5973_v32 }
 0x263   : > { %4643 = vmatprep.mubr.f32.mxu0 %v5973_v32  ;;  %4476 = vmatmul.mubr.f32.gmra.mrb[26].mxu1 %v5979_v50 }
 0x264   : > { %4959 = vmatpush3.bf16.msra.mxu1 %v6073_v1  ;;  %4644 = vmatmul.mubr.f32.gmra.mrb[26].mxu0 %v5979_v50  ;;  %v6899_v1 = vld [vmem:[#allocation30_spill] sm:$0xff] }
 0x265   : > { %4983 = vmatpush3.bf16.msra.mxu0 %v6057_v46  ;;  %4478 = vmatprep.mubr.f32.mxu1 %v6004_v49  ;;  %v6885_v46 = vld [vmem:[#allocation23_spill] sm:$0xff] }
 0x266   : > { %4646 = vmatprep.mubr.f32.mxu0 %v6004_v49 }
 0x267   : > { %4479 = vmatmul.mubr.f32.gmra.mrb[28].mxu1 %v6006_v52 }
 0x268   : > { %4647 = vmatmul.mubr.f32.gmra.mrb[28].mxu0 %v6006_v52  ;;  %4481 = vmatprep.mubr.f32.mxu1 %v6035_v0 }
 0x269   : > { %4649 = vmatprep.mubr.f32.mxu0 %v6035_v0 }
 0x26b   : > { %4482 = vmatmul.mubr.f32.gmra.mrb[30].mxu1 %v6041_v37 }
 0x26c   : > { %4650 = vmatmul.mubr.f32.gmra.mrb[30].mxu0 %v6041_v37  ;;  %4484 = vmatprep.mubr.f32.mxu1 %v6052_v16 }
 0x26d   : > { %4652 = vmatprep.mubr.f32.mxu0 %v6052_v16 }
 0x26f   : > { %4485 = vmatmul.mubr.f32.gmra.mrb[32].mxu1 %v6063_v57 }
 0x270   : > { %4653 = vmatmul.mubr.f32.gmra.mrb[32].mxu0 %v6063_v57  ;;  %4487 = vmatprep.mubr.f32.mxu1 %v6065_v28 }
 0x271   : > { %4655 = vmatprep.mubr.f32.mxu0 %v6065_v28 }
 0x273   : > { %4488 = vmatmul.mubr.f32.gmra.mrb[34].mxu1 %v6101_v24 }
 0x274   : > { %4656 = vmatmul.mubr.f32.gmra.mrb[34].mxu0 %v6101_v24  ;;  %4490 = vmatprep.mubr.f32.mxu1 %v6113_v60 }
 0x275   : > { %4658 = vmatprep.mubr.f32.mxu0 %v6113_v60 }
 0x277   : > { %4491 = vmatmul.mubr.f32.gmra.mrb[36].mxu1 %v6123_v27 }
 0x278   : > { %4659 = vmatmul.mubr.f32.gmra.mrb[36].mxu0 %v6123_v27  ;;  %4493 = vmatprep.mubr.f32.mxu1 %v6125_v14 }
 0x279   : > { %4661 = vmatprep.mubr.f32.mxu0 %v6125_v14 }
 0x27b   : > { %4494 = vmatmul.mubr.f32.gmra.mrb[38].mxu1 %v6157_v13 }
 0x27c   : > { %4662 = vmatmul.mubr.f32.gmra.mrb[38].mxu0 %v6157_v13  ;;  %4496 = vmatprep.mubr.f32.mxu1 %v6171_v23 }
 0x27d   : > { %4664 = vmatprep.mubr.f32.mxu0 %v6171_v23 }
 0x27f   : > { %4497 = vmatmul.mubr.f32.gmra.mrb[40].mxu1 %v6191_v15 }
 0x280   : > { %4665 = vmatmul.mubr.f32.gmra.mrb[40].mxu0 %v6191_v15  ;;  %4499 = vmatprep.mubr.f32.mxu1 %v6199_v22 }
 0x281   : > { %4667 = vmatprep.mubr.f32.mxu0 %v6199_v22 }
 0x283   : > { %4500 = vmatmul.mubr.f32.gmra.mrb[42].mxu1 %v6219_v29 }
 0x284   : > { %4668 = vmatmul.mubr.f32.gmra.mrb[42].mxu0 %v6219_v29  ;;  %4502 = vmatprep.mubr.f32.mxu1 %v6227_v45 }
 0x285   : > { %4670 = vmatprep.mubr.f32.mxu0 %v6227_v45 }
 0x287   : > { %4503 = vmatmul.mubr.f32.gmra.mrb[44].mxu1 %v6238_v26 }
 0x288   : > { %4671 = vmatmul.mubr.f32.gmra.mrb[44].mxu0 %v6238_v26  ;;  %4505 = vmatprep.mubr.f32.mxu1 %v6240_v47 }
 0x289   : > { %4673 = vmatprep.mubr.f32.mxu0 %v6240_v47 }
 0x28b   : > { %4506 = vmatmul.mubr.f32.gmra.mrb[46].mxu1 %v6264_v35 }
 0x28c   : > { %4674 = vmatmul.mubr.f32.gmra.mrb[46].mxu0 %v6264_v35  ;;  %4508 = vmatprep.mubr.f32.mxu1 %v6271_v41 }
 0x28d   : > { %4676 = vmatprep.mubr.f32.mxu0 %v6271_v41 }
 0x28f   : > { %4509 = vmatmul.mubr.f32.gmra.mrb[48].mxu1 %v6294_v48 }
 0x290   : > { %4677 = vmatmul.mubr.f32.gmra.mrb[48].mxu0 %v6294_v48  ;;  %4511 = vmatprep.mubr.f32.mxu1 %v6297_v5 }
 0x291   : > { %4679 = vmatprep.mubr.f32.mxu0 %v6297_v5 }
 0x293   : > { %4512 = vmatmul.mubr.f32.gmra.mrb[50].mxu1 %v6314_v19 }
 0x294   : > { %4680 = vmatmul.mubr.f32.gmra.mrb[50].mxu0 %v6314_v19  ;;  %4514 = vmatprep.mubr.f32.mxu1 %v6319_v17 }
 0x295   : > { %4682 = vmatprep.mubr.f32.mxu0 %v6319_v17 }
 0x297   : > { %4515 = vmatmul.mubr.f32.gmra.mrb[52].mxu1 %v6332_v8 }
 0x298   : > { %4683 = vmatmul.mubr.f32.gmra.mrb[52].mxu0 %v6332_v8  ;;  %4517 = vmatprep.mubr.f32.mxu1 %v6338_v7 }
 0x299   : > { %4685 = vmatprep.mubr.f32.mxu0 %v6338_v7 }
 0x29b   : > { %4518 = vmatmul.mubr.f32.gmra.mrb[54].mxu1 %v6346_v44 }
 0x29c   : > { %4686 = vmatmul.mubr.f32.gmra.mrb[54].mxu0 %v6346_v44  ;;  %4528 = vmatprep.mubr.f32.mxu1 %v5940_v59  ;;  %v6887_v59 = vld [vmem:[#allocation11_spill] sm:$0xff] }
 0x29d   : > { %4696 = vmatprep.mubr.f32.mxu0 %v5937_v21  ;;  %v6886_v21 = vld [vmem:[#allocation24_spill] sm:$0xff] }
 0x29f   : > { %4529 = vmatmul.mubr.f32.vlgmr.msra.gmra.mrb[24].mxu1 %v5970_v2  ;;  %v6889_v2 = vld [vmem:[#allocation14_spill] sm:$0xff] }
 0x2a0   : > { %4697 = vmatmul.mubr.f32.vlgmr.msra.gmra.mrb[24].mxu0 %v5960_v36  ;;  %4531 = vmatprep.mubr.f32.mxu1 %v6882_v40  ;;  %v6888_v36 = vld [vmem:[#allocation12_spill] sm:$0xff] }
 0x2a1   : > { %4699 = vmatprep.mubr.f32.mxu0 %v5973_v32  ;;  %v6890_v32 = vld [vmem:[#allocation28_spill] sm:$0xff] }
 0x2a3   : > { %4532 = vmatmul.mubr.f32.gmra.mrb[26].mxu1 %v6883_v61 }
 0x2a4   : > { %4700 = vmatmul.mubr.f32.gmra.mrb[26].mxu0 %v5979_v50  ;;  %4534 = vmatprep.mubr.f32.mxu1 %v6884_v34  ;;  %v6891_v50 = vld [vmem:[#allocation29_spill] sm:$0xff] }
 0x2a5   : > { %4702 = vmatprep.mubr.f32.mxu0 %v6004_v49  ;;  %v6892_v49 = vld [vmem:[#allocation26_spill] sm:$0xff] }
 0x2a7   : > { %4535 = vmatmul.mubr.f32.gmra.mrb[28].mxu1 %v6885_v46 }
 0x2a8   : > { %4703 = vmatmul.mubr.f32.gmra.mrb[28].mxu0 %v6006_v52  ;;  %4537 = vmatprep.mubr.f32.mxu1 %v6886_v21  ;;  %v6893_v52 = vld [vmem:[#allocation32_spill] sm:$0xff]  ;;  %v1474_v21 = vld [vmem:[%s6704_s4 + $0x48] sm:$0xff] }
 0x2a9   : > { %4705 = vmatprep.mubr.f32.mxu0 %v6035_v0  ;;  %v6894_v0 = vld [vmem:[#allocation33_spill] sm:$0xff] }
 0x2ab   : > { %4538 = vmatmul.mubr.f32.gmra.mrb[30].mxu1 %v6887_v59 }
 0x2ac   : > { %4706 = vmatmul.mubr.f32.gmra.mrb[30].mxu0 %v6041_v37  ;;  %4540 = vmatprep.mubr.f32.mxu1 %v6888_v36  ;;  %v6895_v37 = vld [vmem:[#allocation16_spill] sm:$0xff]  ;;  %v1473_v36 = vld [vmem:[%s6704_s4 + $0x40] sm:$0xff] }
 0x2ad   : > { %4708 = vmatprep.mubr.f32.mxu0 %v6052_v16  ;;  %v6896_v16 = vld [vmem:[#allocation18_spill] sm:$0xff] }
 0x2af   : > { %4541 = vmatmul.mubr.f32.gmra.mrb[32].mxu1 %v6889_v2 }
 0x2b0   : > { %4709 = vmatmul.mubr.f32.gmra.mrb[32].mxu0 %v6063_v57  ;;  %4543 = vmatprep.mubr.f32.mxu1 %v6890_v32  ;;  %v6897_v57 = vld [vmem:[#allocation21_spill] sm:$0xff] }
 0x2b1   : > { %4711 = vmatprep.mubr.f32.mxu0 %v6065_v28  ;;  %v6898_v28 = vld [vmem:[#allocation25_spill] sm:$0xff] }
 0x2b3   : > { %4544 = vmatmul.mubr.f32.gmra.mrb[34].mxu1 %v6891_v50 }
 0x2b4   : > { %4712 = vmatmul.mubr.f32.gmra.mrb[34].mxu0 %v6101_v24  ;;  %4546 = vmatprep.mubr.f32.mxu1 %v6892_v49  ;;  %v6900_v24 = vld [vmem:[#allocation34_spill] sm:$0xff] }
 0x2b5   : > { %4714 = vmatprep.mubr.f32.mxu0 %v6113_v60  ;;  %v6901_v60 = vld [vmem:[#allocation8_spill] sm:$0xff] }
 0x2b7   : > { %4547 = vmatmul.mubr.f32.gmra.mrb[36].mxu1 %v6893_v52 }
 0x2b8   : > { %4715 = vmatmul.mubr.f32.gmra.mrb[36].mxu0 %v6123_v27  ;;  %4549 = vmatprep.mubr.f32.mxu1 %v6894_v0  ;;  %v6902_v27 = vld [vmem:[#allocation4_spill] sm:$0xff] }
 0x2b9   : > { %4717 = vmatprep.mubr.f32.mxu0 %v6125_v14  ;;  %v6903_v14 = vld [vmem:[#allocation36_spill] sm:$0xff] }
 0x2bb   : > { %4550 = vmatmul.mubr.f32.gmra.mrb[38].mxu1 %v6895_v37 }
 0x2bc   : > { %4718 = vmatmul.mubr.f32.gmra.mrb[38].mxu0 %v6157_v13  ;;  %4552 = vmatprep.mubr.f32.mxu1 %v6896_v16  ;;  %v6904_v13 = vld [vmem:[#allocation9_spill] sm:$0xff] }
 0x2bd   : > { %4720 = vmatprep.mubr.f32.mxu0 %v6171_v23  ;;  %v1466_v23 = vld [vmem:[%s6704_s4 + $0x8] sm:$0xff] }
 0x2bf   : > { %4553 = vmatmul.mubr.f32.gmra.mrb[40].mxu1 %v6897_v57 }
 0x2c0   : > { %4721 = vmatmul.mubr.f32.gmra.mrb[40].mxu0 %v6191_v15  ;;  %4555 = vmatprep.mubr.f32.mxu1 %v6898_v28 }
 0x2c1   : > { %4723 = vmatprep.mubr.f32.mxu0 %v6199_v22 }
 0x2c3   : > { %4556 = vmatmul.mubr.f32.gmra.mrb[42].mxu1 %v6899_v1 }
 0x2c4   : > { %4724 = vmatmul.mubr.f32.gmra.mrb[42].mxu0 %v6219_v29  ;;  %4558 = vmatprep.mubr.f32.mxu1 %v6900_v24 }
 0x2c5   : > { %4726 = vmatprep.mubr.f32.mxu0 %v6227_v45 }
 0x2c7   : > { %4559 = vmatmul.mubr.f32.gmra.mrb[44].mxu1 %v6901_v60  ;;  %v1476_v60 = vld [vmem:[%s6704_s4 + $0x58] sm:$0xff] }
 0x2c8   : > { %4727 = vmatmul.mubr.f32.gmra.mrb[44].mxu0 %v6238_v26  ;;  %4561 = vmatprep.mubr.f32.mxu1 %v6902_v27 }
 0x2c9   : > { %4729 = vmatprep.mubr.f32.mxu0 %v6240_v47  ;;  %v1468_v47 = vld [vmem:[%s6704_s4 + $0x18] sm:$0xff] }
 0x2cb   : > { %4562 = vmatmul.mubr.f32.gmra.mrb[46].mxu1 %v6903_v14 }
 0x2cc   : > { %4730 = vmatmul.mubr.f32.gmra.mrb[46].mxu0 %v6264_v35  ;;  %4564 = vmatprep.mubr.f32.mxu1 %v6904_v13  ;;  %v1467_v35 = vld [vmem:[%s6704_s4 + $0x10] sm:$0xff] }
 0x2cd   : > { %4732 = vmatprep.mubr.f32.mxu0 %v6271_v41  ;;  %v1475_v13 = vld [vmem:[%s6704_s4 + $0x50] sm:$0xff] }
 0x2cf   : > { %4565 = vmatmul.mubr.f32.gmra.mrb[48].mxu1 %v6312_v62 }
 0x2d0   : > { %4733 = vmatmul.mubr.f32.gmra.mrb[48].mxu0 %v6294_v48  ;;  %4567 = vmatprep.mubr.f32.mxu1 %v6317_v31  ;;  %v5355_v48 = vmov 0  }
 0x2d1   : > { %4735 = vmatprep.mubr.f32.mxu0 %v6297_v5  ;;  %5185 = vset.pattern.permute.xlu1 %v5355_v48 }
 0x2d2   : > { %5186 = vset.pattern.permute.xlu0 %v5355_v48 }
 0x2d3   : > { %4568 = vmatmul.mubr.f32.gmra.mrb[50].mxu1 %v6330_v20 }
 0x2d4   : > { %4736 = vmatmul.mubr.f32.gmra.mrb[50].mxu0 %v6314_v19  ;;  %4570 = vmatprep.mubr.f32.mxu1 %v6336_v33 }
 0x2d5   : > { %4738 = vmatprep.mubr.f32.mxu0 %v6319_v17  ;;  %v1465_v17 = vld [vmem:[%s6704_s4] sm:$0xff] }
 0x2d7   : > { %4571 = vmatmul.mubr.f32.gmra.mrb[52].mxu1 %v6344_v4 }
 0x2d8   : > { %4739 = vmatmul.mubr.f32.gmra.mrb[52].mxu0 %v6332_v8  ;;  %4573 = vmatprep.mubr.f32.mxu1 %v6351_v3 }
 0x2d9   : > { %4741 = vmatprep.mubr.f32.mxu0 %v6338_v7  ;;  %v1470_v7 = vld [vmem:[%s6704_s4 + $0x28] sm:$0xff] }
 0x2db   : > { %4574 = vmatmul.mubr.f32.gmra.mrb[54].mxu1 %v6356_v11 }
 0x2dc   : > { %4742 = vmatmul.mubr.f32.gmra.mrb[54].mxu0 %v6346_v44  ;;  %v1469_v44 = vld [vmem:[%s6704_s4 + $0x20] sm:$0xff] }
 0x372   : > { %v4530_v45 = vpop.f32.mrb[24].mxu1 }
 0x373   : > { %v4984_v15 = vadd.f32 %v4530_v45, %v1466_v23  ;;  %v4698_v41 = vpop.f32.mrb[24].mxu0  ;;  %v2336_v22 = vpop.f32.mrb[25].mxu1 }
 0x374   : > { %v4986_v29 = vadd.f32 %v2336_v22, %v1465_v17  ;;  %v3222_v26 = vpop.f32.mrb[25].mxu0 }
 0x375   : > { %v4985_v31 = vadd.f32 %v4984_v15, %v4698_v41 }
 0x376   : > { %v4987_v4 = vadd.f32 %v4986_v29, %v3222_v26  ;;  %v4533_v5 = vpop.f32.mrb[26].mxu1 }
 0x377   : > { %v3893_v62 = vmul.f32 -1.442695, %v4985_v31  ;;  %v4988_v19 = vadd.f32 %v4533_v5, %v1468_v47  ;;  %v4701_v25 = vpop.f32.mrb[26].mxu0  ;;  %v2350_v20 = vpop.f32.mrb[27].mxu1  ;;  %v1477_v5 = vld [vmem:[%s6704_s4 + $0x60] sm:$0xff] }
 0x378   : > { %v3892_v8 = vmul.f32 -1.442695, %v4987_v4  ;;  %v4990_v42 = vadd.f32 %v2350_v20, %v1467_v35  ;;  %v3234_v33 = vpop.f32.mrb[27].mxu0  ;;  %v1478_v35 = vld [vmem:[%s6704_s4 + $0x68] sm:$0xff] }
 0x379   : > { %5187 = vpow2.f32 %v3893_v62  ;;  %v4989_v63 = vadd.f32 %v4988_v19, %v4701_v25 }
 0x37a   : > { %5189 = vpow2.f32 %v3892_v8  ;;  %v4991_v3 = vadd.f32 %v4990_v42, %v3234_v33  ;;  %v4536_v39 = vpop.f32.mrb[28].mxu1 }
 0x37b   : > { %v3895_v58 = vmul.f32 -1.442695, %v4989_v63  ;;  %v4992_v53 = vadd.f32 %v4536_v39, %v1470_v7  ;;  %v4704_v11 = vpop.f32.mrb[28].mxu0  ;;  %v2364_v18 = vpop.f32.mrb[29].mxu1 }
 0x37c   : > { %v3894_v30 = vmul.f32 -1.442695, %v4991_v3  ;;  %v4994_v12 = vadd.f32 %v2364_v18, %v1469_v44  ;;  %v3246_v51 = vpop.f32.mrb[29].mxu0 }
 0x37d   : > { %5191 = vpow2.f32 %v3895_v58  ;;  %v4993_v6 = vadd.f32 %v4992_v53, %v4704_v11  ;;  %v1480_v58 = vld [vmem:[%s6704_s4 + $0x78] sm:$0xff]  ;;  %v1479_v11 = vld [vmem:[%s6704_s4 + $0x70] sm:$0xff] }
 0x37e   : > { %5193 = vpow2.f32 %v3894_v30  ;;  %v4995_v38 = vadd.f32 %v4994_v12, %v3246_v51  ;;  %v4539_v56 = vpop.f32.mrb[30].mxu1 }
 0x37f   : > { %v3897_v9 = vmul.f32 -1.442695, %v4993_v6  ;;  %v4996_v43 = vadd.f32 %v4539_v56, %v1472_v54  ;;  %v4707_v10 = vpop.f32.mrb[30].mxu0  ;;  %v2378_v40 = vpop.f32.mrb[31].mxu1 }
 0x380   : > { %v3896_v61 = vmul.f32 -1.442695, %v4995_v38  ;;  %v4998_v34 = vadd.f32 %v2378_v40, %v1471_v55  ;;  %v3258_v46 = vpop.f32.mrb[31].mxu0 }
 0x381   : > { %5195 = vpow2.f32 %v3897_v9  ;;  %v4997_v59 = vadd.f32 %v4996_v43, %v4707_v10 }
 0x382   : > { %5197 = vpow2.f32 %v3896_v61  ;;  %v4999_v2 = vadd.f32 %v4998_v34, %v3258_v46  ;;  %v4542_v32 = vpop.f32.mrb[32].mxu1  ;;  %v1482_v61 = vld [vmem:[%s6704_s4 + $0x88] sm:$0xff] }
 0x383   : > { %v5188_v50 = vpop.eup %5187  ;;  %v3899_v49 = vmul.f32 -1.442695, %v4997_v59  ;;  %v5000_v52 = vadd.f32 %v4542_v32, %v1474_v21  ;;  %v4710_v0 = vpop.f32.mrb[32].mxu0  ;;  %v1481_v59 = vld [vmem:[%s6704_s4 + $0x80] sm:$0xff] }
 0x384   : > { %v2392_v37 = vpop.f32.mrb[33].mxu1  ;;  %v5190_v16 = vpop.eup %5189  ;;  %v3509_v57 = vadd.f32 1.0, %v5188_v50  ;;  %v3898_v28 = vmul.f32 -1.442695, %v4999_v2 }
 0x385   : > { %v5002_v1 = vadd.f32 %v2392_v37, %v1473_v36  ;;  %v3270_v24 = vpop.f32.mrb[33].mxu0  ;;  %v3508_v27 = vadd.f32 1.0, %v5190_v16  ;;  %5199 = vpow2.f32 %v3899_v49  ;;  %v5001_v14 = vadd.f32 %v5000_v52, %v4710_v0 }
 0x386   : > { %5201 = vrcp.f32 %v3509_v57  ;;  %v4545_v23 = vpop.f32.mrb[34].mxu1 }
 0x387   : > { %v5003_v48 = vadd.f32 %v5002_v1, %v3270_v24  ;;  %v5192_v17 = vpop.eup %5191  ;;  %5203 = vrcp.f32 %v3508_v27  ;;  %v3901_v45 = vmul.f32 -1.442695, %v5001_v14  ;;  %v5004_v15 = vadd.f32 %v4545_v23, %v1476_v60  ;;  %v4713_v41 = vpop.f32.mrb[34].mxu0  ;;  %v1484_v60 = vld [vmem:[%s6704_s4 + $0x98] sm:$0xff] }
 0x388   : > { %v2406_v22 = vpop.f32.mrb[35].mxu1  ;;  %v5194_v29 = vpop.eup %5193  ;;  %v3511_v26 = vadd.f32 1.0, %v5192_v17  ;;  %5205 = vpow2.f32 %v3898_v28 }
 0x389   : > { %v5006_v47 = vadd.f32 %v2406_v22, %v1475_v13  ;;  %v3282_v31 = vpop.f32.mrb[35].mxu0  ;;  %5207 = vpow2.f32 %v3901_v45  ;;  %v5005_v4 = vadd.f32 %v5004_v15, %v4713_v41  ;;  %v3510_v62 = vadd.f32 1.0, %v5194_v29  ;;  %v1483_v13 = vld [vmem:[%s6704_s4 + $0x90] sm:$0xff] }
 0x38a   : > { %5209 = vrcp.f32 %v3511_v26  ;;  %v4548_v25 = vpop.f32.mrb[36].mxu1  ;;  %v3900_v44 = vmul.f32 -1.442695, %v5003_v48 }
 0x38b   : > { %v5007_v19 = vadd.f32 %v5006_v47, %v3282_v31  ;;  %v5196_v20 = vpop.eup %5195  ;;  %v3903_v8 = vmul.f32 -1.442695, %v5005_v4  ;;  %v5008_v42 = vadd.f32 %v4548_v25, %v1478_v35  ;;  %v4716_v33 = vpop.f32.mrb[36].mxu0  ;;  %v1486_v4 = vld [vmem:[%s6704_s4 + $0xa8] sm:$0xff] }
 0x38c   : > { %v2420_v7 = vpop.f32.mrb[37].mxu1  ;;  %v5198_v63 = vpop.eup %5197  ;;  %v3513_v18 = vadd.f32 1.0, %v5196_v20 }
 0x38d   : > { %v5010_v3 = vadd.f32 %v2420_v7, %v1477_v5  ;;  %v3294_v39 = vpop.f32.mrb[37].mxu0  ;;  %5211 = vpow2.f32 %v3903_v8  ;;  %v5009_v53 = vadd.f32 %v5008_v42, %v4716_v33  ;;  %v3512_v54 = vadd.f32 1.0, %v5198_v63 }
 0x38e   : > { %5213 = vrcp.f32 %v3510_v62  ;;  %v4551_v12 = vpop.f32.mrb[38].mxu1  ;;  %v3902_v43 = vmul.f32 -1.442695, %v5007_v19  ;;  %v1485_v19 = vld [vmem:[%s6704_s4 + $0xa0] sm:$0xff] }
 0x38f   : > { %v5011_v30 = vadd.f32 %v5010_v3, %v3294_v39  ;;  %v5200_v51 = vpop.eup %5199  ;;  %v3905_v6 = vmul.f32 -1.442695, %v5009_v53  ;;  %v5012_v55 = vadd.f32 %v4551_v12, %v1480_v58  ;;  %v4719_v38 = vpop.f32.mrb[38].mxu0  ;;  %5215 = vpow2.f32 %v3900_v44 }
 0x390   : > { %v2434_v56 = vpop.f32.mrb[39].mxu1  ;;  %v5202_v9 = vpop.eup %5201  ;;  %v3515_v46 = vadd.f32 1.0, %v5200_v51  ;;  %v1487_v51 = vld [vmem:[%s6704_s4 + $0xb0] sm:$0xff] }
 0x391   : > { %v5014_v10 = vadd.f32 %v2434_v56, %v1479_v11  ;;  %v3306_v40 = vpop.f32.mrb[39].mxu0  ;;  %v5204_v34 = vpop.eup %5203  ;;  %5217 = vpow2.f32 %v3905_v6  ;;  %v5013_v21 = vadd.f32 %v5012_v55, %v4719_v38  ;;  %3611 = vperm.xlu1 %5185, %v5202_v9   ;;  %v3904_v28 = vmul.f32 -1.442695, %v5011_v30  ;;  %v1488_v11 = vld [vmem:[%s6704_s4 + $0xb8] sm:$0xff] }
 0x392   : > { %v5206_v36 = vpop.eup %5205  ;;  %5219 = vrcp.f32 %v3513_v18  ;;  %3606 = vperm.xlu0 %5186, %v5204_v34   ;;  %v4554_v32 = vpop.f32.mrb[40].mxu1 }
 0x393   : > { %v5015_v2 = vadd.f32 %v5014_v10, %v3306_v40  ;;  %v5208_v50 = vpop.eup %5207  ;;  %5221 = vrcp.f32 %v3512_v54  ;;  %v3907_v49 = vmul.f32 -1.442695, %v5013_v21  ;;  %v4722_v52 = vpop.f32.mrb[40].mxu0  ;;  %v5016_v0 = vadd.f32 %v4554_v32, %v1482_v61  ;;  %v1490_v21 = vld [vmem:[%s6704_s4 + $0xc8] sm:$0xff]  ;;  %v1489_v32 = vld [vmem:[%s6704_s4 + $0xc0] sm:$0xff] }
 0x394   : > { %v2448_v37 = vpop.f32.mrb[41].mxu1  ;;  %v5210_v16 = vpop.eup %5209  ;;  %v3517_v57 = vadd.f32 1.0, %v5208_v50  ;;  %5223 = vpow2.f32 %v3902_v43  ;;  %v3514_v27 = vadd.f32 1.0, %v5206_v36 }
 0x395   : > { %v5018_v1 = vadd.f32 %v2448_v37, %v1481_v59  ;;  %v3318_v24 = vpop.f32.mrb[41].mxu0  ;;  %5225 = vrcp.f32 %v3515_v46  ;;  %v5017_v14 = vadd.f32 %v5016_v0, %v4722_v52  ;;  %3621 = vperm.xlu1 %5185, %v5210_v16   ;;  %v3906_v47 = vmul.f32 -1.442695, %v5015_v2 }
 0x396   : > { %5227 = vrcp.f32 %v3517_v57  ;;  %v4557_v23 = vpop.f32.mrb[42].mxu1 }
 0x397   : > { %v5019_v48 = vadd.f32 %v5018_v1, %v3318_v24  ;;  %v5212_v17 = vpop.eup %5211  ;;  %5229 = vpow2.f32 %v3907_v49  ;;  %v3909_v45 = vmul.f32 -1.442695, %v5017_v14  ;;  %v5020_v15 = vadd.f32 %v4557_v23, %v1484_v60  ;;  %v4725_v41 = vpop.f32.mrb[42].mxu0 }
 0x398   : > { %v2462_v22 = vpop.f32.mrb[43].mxu1  ;;  %v5214_v29 = vpop.eup %5213  ;;  %v3519_v26 = vadd.f32 1.0, %v5212_v17  ;;  %5231 = vpow2.f32 %v3904_v28 }
 0x399   : > { %v5022_v31 = vadd.f32 %v2462_v22, %v1483_v13  ;;  %v3330_v35 = vpop.f32.mrb[43].mxu0  ;;  %5233 = vrcp.f32 %v3514_v27  ;;  %v3908_v5 = vmul.f32 -1.442695, %v5019_v48  ;;  %v5021_v62 = vadd.f32 %v5020_v15, %v4725_v41  ;;  %3616 = vperm.xlu1 %5185, %v5214_v29   ;;  %v5216_v25 = vpop.eup %5215  ;;  %v1492_v13 = vld [vmem:[%s6704_s4 + $0xd8] sm:$0xff] }
 0x39a   : > { %5235 = vrcp.f32 %v3519_v26  ;;  %v4560_v8 = vpop.f32.mrb[44].mxu1  ;;  %v3516_v30 = vadd.f32 1.0, %v5216_v25 }
 0x39b   : > { %v5023_v20 = vadd.f32 %v5022_v31, %v3330_v35  ;;  %v5218_v42 = vpop.eup %5217  ;;  %5237 = vpow2.f32 %v3909_v45  ;;  %v3911_v33 = vmul.f32 -1.442695, %v5021_v62  ;;  %v5024_v7 = vadd.f32 %v4560_v8, %v1486_v4  ;;  %v4728_v63 = vpop.f32.mrb[44].mxu0  ;;  %v1491_v45 = vld [vmem:[%s6704_s4 + $0xd0] sm:$0xff] }
 0x39c   : > { %v2476_v44 = vpop.f32.mrb[45].mxu1  ;;  %v5220_v3 = vpop.eup %5219  ;;  %v3521_v39 = vadd.f32 1.0, %v5218_v42  ;;  %5239 = vpow2.f32 %v3906_v47 }
 0x39d   : > { %v5026_v58 = vadd.f32 %v2476_v44, %v1485_v19  ;;  %v3342_v53 = vpop.f32.mrb[45].mxu0  ;;  %v5222_v18 = vpop.eup %5221  ;;  %5241 = vpow2.f32 %v3908_v5  ;;  %v5025_v12 = vadd.f32 %v5024_v7, %v4728_v63  ;;  %3631 = vperm.xlu1 %5185, %v5220_v3   ;;  %v3910_v56 = vmul.f32 -1.442695, %v5023_v20  ;;  %v1494_v20 = vld [vmem:[%s6704_s4 + $0xe8] sm:$0xff] }
 0x39e   : > { %v5224_v54 = vpop.eup %5223  ;;  %5243 = vrcp.f32 %v3521_v39  ;;  %v4563_v55 = vpop.f32.mrb[46].mxu1 }
 0x39f   : > { %v5027_v6 = vadd.f32 %v5026_v58, %v3342_v53  ;;  %v5226_v38 = vpop.eup %5225  ;;  %5245 = vpow2.f32 %v3911_v33  ;;  %v3913_v9 = vmul.f32 -1.442695, %v5025_v12  ;;  %v5028_v43 = vadd.f32 %v4563_v55, %v1488_v11  ;;  %v4731_v10 = vpop.f32.mrb[46].mxu0  ;;  %v1493_v33 = vld [vmem:[%s6704_s4 + $0xe0] sm:$0xff] }
 0x3a0   : > { %v2490_v40 = vpop.f32.mrb[47].mxu1  ;;  %v5228_v61 = vpop.eup %5227  ;;  %5247 = vrcp.f32 %v3516_v30  ;;  %v3518_v36 = vadd.f32 1.0, %v5224_v54 }
 0x3a1   : > { %v5030_v34 = vadd.f32 %v2490_v40, %v1487_v51  ;;  %v3354_v46 = vpop.f32.mrb[47].mxu0  ;;  %v5230_v59 = vpop.eup %5229  ;;  %v5029_v2 = vadd.f32 %v5028_v43, %v4731_v10  ;;  %3626 = vperm.xlu1 %5185, %v5222_v18   ;;  %3651 = vperm.xlu0 %5186, %v5228_v61   ;;  %5249 = vpow2.f32 %v3913_v9  ;;  %v3912_v16 = vmul.f32 -1.442695, %v5027_v6  ;;  %v1496_v6 = vld [vmem:[%s6704_s4 + $0xf8] sm:$0xff]  ;;  %v1495_v43 = vld [vmem:[%s6704_s4 + $0xf0] sm:$0xff] }
 0x3a2   : > { %v5232_v50 = vpop.eup %5231  ;;  %v3523_v49 = vadd.f32 1.0, %v5230_v59  ;;  %v4566_v0 = vpop.f32.mrb[48].mxu1  ;;  %5251 = vpow2.f32 %v3910_v56 }
 0x3a3   : > { %v5031_v52 = vadd.f32 %v5030_v34, %v3354_v46  ;;  %v5234_v37 = vpop.eup %5233  ;;  %v3915_v57 = vmul.f32 -1.442695, %v5029_v2  ;;  %v5032_v28 = vadd.f32 %v4566_v0, %v1490_v21  ;;  %v4734_v1 = vpop.f32.mrb[48].mxu0  ;;  %v3520_v23 = vadd.f32 1.0, %v5232_v50 }
 0x3a4   : > { %v2504_v24 = vpop.f32.mrb[49].mxu1  ;;  %v5236_v60 = vpop.eup %5235  ;;  %5253 = vrcp.f32 %v3523_v49 }
 0x3a5   : > { %v5034_v27 = vadd.f32 %v2504_v24, %v1489_v32  ;;  %v3366_v14 = vpop.f32.mrb[49].mxu0  ;;  %v5238_v48 = vpop.eup %5237  ;;  %5255 = vrcp.f32 %v3518_v36  ;;  %v5033_v17 = vadd.f32 %v5032_v28, %v4734_v1  ;;  %3641 = vperm.xlu1 %5185, %v5226_v38   ;;  %3661 = vperm.xlu0 %5186, %v5236_v60   ;;  %v3914_v47 = vmul.f32 -1.442695, %v5031_v52 }
 0x3a6   : > { %v5240_v15 = vpop.eup %5239  ;;  %v3525_v41 = vadd.f32 1.0, %v5238_v48  ;;  %5257 = vpow2.f32 %v3915_v57  ;;  %v4569_v29 = vpop.f32.mrb[50].mxu1 }
 0x3a7   : > { %v5035_v22 = vadd.f32 %v5034_v27, %v3366_v14  ;;  %v5242_v26 = vpop.eup %5241  ;;  %5259 = vpow2.f32 %v3912_v16  ;;  %v3917_v31 = vmul.f32 -1.442695, %v5033_v17  ;;  %v5036_v35 = vadd.f32 %v4569_v29, %v1492_v13  ;;  %v4737_v4 = vpop.f32.mrb[50].mxu0 }
 0x3a8   : > { %v2518_v5 = vpop.f32.mrb[51].mxu1  ;;  %v5244_v62 = vpop.eup %5243  ;;  %5261 = vrcp.f32 %v3525_v41  ;;  %v3522_v7 = vadd.f32 1.0, %v5240_v15  ;;  %v3524_v12 = vadd.f32 1.0, %v5242_v26 }
 0x3a9   : > { %v5038_v19 = vadd.f32 %v2518_v5, %v1491_v45  ;;  %v3378_v25 = vpop.f32.mrb[51].mxu0  ;;  %v5246_v8 = vpop.eup %5245  ;;  %5263 = vrcp.f32 %v3520_v23  ;;  %v5037_v42 = vadd.f32 %v5036_v35, %v4737_v4  ;;  %3636 = vperm.xlu1 %5185, %v5234_v37   ;;  %3671 = vperm.xlu0 %5186, %v5244_v62   ;;  %v3916_v56 = vmul.f32 -1.442695, %v5035_v22 }
 0x3aa   : > { %v3527_v63 = vadd.f32 1.0, %v5246_v8  ;;  %5265 = vpow2.f32 %v3917_v31  ;;  %v4572_v3 = vpop.f32.mrb[52].mxu1  ;;  %v5248_v39 = vpop.eup %5247 }
 0x3ab   : > { %v5039_v44 = vadd.f32 %v5038_v19, %v3378_v25  ;;  %5267 = vpow2.f32 %v3914_v47  ;;  %v3919_v58 = vmul.f32 -1.442695, %v5037_v42  ;;  %v5040_v53 = vadd.f32 %v4572_v3, %v1494_v20  ;;  %v4740_v11 = vpop.f32.mrb[52].mxu0  ;;  %v2532_v18 = vpop.f32.mrb[53].mxu1 }
 0x3ac   : > { %v5250_v30 = vpop.eup %5249  ;;  %5269 = vrcp.f32 %v3527_v63  ;;  %v5042_v51 = vadd.f32 %v2532_v18, %v1493_v33  ;;  %v3390_v54 = vpop.f32.mrb[53].mxu0 }
 0x3ad   : > { %v5252_v55 = vpop.eup %5251  ;;  %v3529_v38 = vadd.f32 1.0, %v5250_v30  ;;  %5271 = vpow2.f32 %v3919_v58  ;;  %v5041_v9 = vadd.f32 %v5040_v53, %v4740_v11  ;;  %3646 = vperm.xlu1 %5185, %v5248_v39   ;;  %v3918_v37 = vmul.f32 -1.442695, %v5039_v44 }
 0x3ae   : > { %v5254_v10 = vpop.eup %5253  ;;  %5273 = vrcp.f32 %v3522_v7  ;;  %v5043_v40 = vadd.f32 %v5042_v51, %v3390_v54  ;;  %v4575_v61 = vpop.f32.mrb[54].mxu1  ;;  %v3526_v32 = vadd.f32 1.0, %v5252_v55 }
 0x3af   : > { %v5256_v34 = vpop.eup %5255  ;;  %5275 = vrcp.f32 %v3529_v38  ;;  %v3921_v46 = vmul.f32 -1.442695, %v5041_v9  ;;  %3681 = vperm.xlu0 %5186, %v5254_v10   ;;  %v5044_v21 = vadd.f32 %v4575_v61, %v1496_v6  ;;  %v4743_v59 = vpop.f32.mrb[54].mxu0  ;;  %v5315_v6 = vld [vmem:[%s5402_s23 + $0x8] sm:$0xff]  ;;  %v5317_v10 = vld [vmem:[%s5402_s23 + $0x18] sm:$0xff] }
 0x3b0   : > { %v2546_v36 = vpop.f32.mrb[55].mxu1  ;;  %v5258_v2 = vpop.eup %5257  ;;  %5277 = vrcp.f32 %v3524_v12  ;;  %v3920_v48 = vmul.f32 -1.442695, %v5043_v40 }
 0x3b1   : > { %v5046_v50 = vadd.f32 %v2546_v36, %v1495_v43  ;;  %v3402_v49 = vpop.f32.mrb[55].mxu0  ;;  %v5260_v52 = vpop.eup %5259  ;;  %v3531_v0 = vadd.f32 1.0, %v5258_v2  ;;  %5279 = vpow2.f32 %v3916_v56  ;;  %v5045_v16 = vadd.f32 %v5044_v21, %v4743_v59  ;;  %3656 = vperm.xlu1 %5185, %v5256_v34   ;;  %v5316_v56 = vld [vmem:[%s5402_s23] sm:$0xff]  ;;  %v5318_v34 = vld [vmem:[%s5402_s23 + $0x10] sm:$0xff]  ;;  %v5319_v59 = vld [vmem:[%s5402_s23 + $0x28] sm:$0xff] }
 0x3b2   : > { %v5262_v57 = vpop.eup %5261  ;;  %5281 = vpow2.f32 %v3921_v46  ;;  %v3528_v27 = vadd.f32 1.0, %v5260_v52  ;;  %v5321_v52 = vld [vmem:[%s5402_s23 + $0x48] sm:$0xff] }
 0x3b3   : > { %v5047_v28 = vadd.f32 %v5046_v50, %v3402_v49  ;;  %v5264_v1 = vpop.eup %5263  ;;  %5283 = vrcp.f32 %v3531_v0  ;;  %v3923_v24 = vmul.f32 -1.442695, %v5045_v16  ;;  %3691 = vperm.xlu0 %5186, %v5262_v57   ;;  %v5320_v50 = vld [vmem:[%s5402_s23 + $0x20] sm:$0xff]  ;;  %v5322_v57 = vld [vmem:[%s5402_s23 + $0x38] sm:$0xff] }
 0x3b4   : > { %v5266_v60 = vpop.eup %5265  ;;  %5285 = vrcp.f32 %v3526_v32 }
 0x3b5   : > { %v5268_v14 = vpop.eup %5267  ;;  %v3533_v13 = vadd.f32 1.0, %v5266_v60  ;;  %5287 = vpow2.f32 %v3918_v37  ;;  %3666 = vperm.xlu1 %5185, %v5264_v1   ;;  %v3922_v22 = vmul.f32 -1.442695, %v5047_v28  ;;  %v5323_v1 = vld [vmem:[%s5402_s23 + $0x58] sm:$0xff] }
 0x3b6   : > { %v5270_v23 = vpop.eup %5269  ;;  %5289 = vpow2.f32 %v3923_v24  ;;  %v3530_v26 = vadd.f32 1.0, %v5268_v14  ;;  %v5324_v14 = vld [vmem:[%s5402_s23 + $0x30] sm:$0xff] }
 0x3b7   : > { %v5272_v17 = vpop.eup %5271  ;;  %5291 = vrcp.f32 %v3533_v13  ;;  %3701 = vperm.xlu0 %5186, %v5270_v23  }
 0x3b8   : > { %v5274_v45 = vpop.eup %5273  ;;  %5293 = vrcp.f32 %v3528_v27  ;;  %v3535_v15 = vadd.f32 1.0, %v5272_v17 }
 0x3b9   : > { %v5276_v41 = vpop.eup %5275  ;;  %5295 = vpow2.f32 %v3920_v48  ;;  %3676 = vperm.xlu1 %5185, %v5274_v45   ;;  %v5325_v48 = vld [vmem:[%s5402_s23 + $0x68] sm:$0xff]  ;;  %v5326_v45 = vld [vmem:[%s5402_s23 + $0x40] sm:$0xff] }
 0x3ba   : > { %v5278_v29 = vpop.eup %5277  ;;  %5297 = vrcp.f32 %v3535_v15 }
 0x3bb   : > { %v5280_v47 = vpop.eup %5279  ;;  %3711 = vperm.xlu0 %5186, %v5276_v41   ;;  %5299 = vpow2.f32 %v3922_v22  ;;  %v5327_v22 = vld [vmem:[%s5402_s23 + $0x78] sm:$0xff] }
 0x3bc   : > { %v5282_v31 = vpop.eup %5281  ;;  %5301 = vrcp.f32 %v3530_v26  ;;  %v3532_v62 = vadd.f32 1.0, %v5280_v47  ;;  %v5328_v47 = vld [vmem:[%s5402_s23 + $0x50] sm:$0xff] }
 0x3bd   : > { %v5284_v35 = vpop.eup %5283  ;;  %v3537_v4 = vadd.f32 1.0, %v5282_v31  ;;  %3686 = vperm.xlu1 %5185, %v5278_v29  }
 0x3be   : > { %v5286_v5 = vpop.eup %5285 }
 0x3bf   : > { %v5288_v19 = vpop.eup %5287  ;;  %5303 = vrcp.f32 %v3537_v4  ;;  %3721 = vperm.xlu0 %5186, %v5284_v35   ;;  %v5329_v4 = vld [vmem:[%s5402_s23 + $0x88] sm:$0xff] }
 0x3c0   : > { %v5290_v25 = vpop.eup %5289  ;;  %5305 = vrcp.f32 %v3532_v62  ;;  %v3534_v33 = vadd.f32 1.0, %v5288_v19  ;;  %v5330_v19 = vld [vmem:[%s5402_s23 + $0x60] sm:$0xff] }
 0x3c1   : > { %v5292_v20 = vpop.eup %5291  ;;  %v3539_v8 = vadd.f32 1.0, %v5290_v25  ;;  %3696 = vperm.xlu1 %5185, %v5286_v5  }
 0x3c2   : > { %v5294_v42 = vpop.eup %5293 }
 0x3c3   : > { %v5296_v7 = vpop.eup %5295  ;;  %5307 = vrcp.f32 %v3539_v8  ;;  %3731 = vperm.xlu0 %5186, %v5292_v20   ;;  %v5331_v8 = vld [vmem:[%s5402_s23 + $0x98] sm:$0xff] }
 0x3c4   : > { %v5298_v63 = vpop.eup %5297  ;;  %5309 = vrcp.f32 %v3534_v33  ;;  %v3536_v44 = vadd.f32 1.0, %v5296_v7  ;;  %v5332_v7 = vld [vmem:[%s5402_s23 + $0x70] sm:$0xff] }
 0x3c5   : > { %3706 = vperm.xlu1 %5185, %v5294_v42   ;;  %v5300_v3 = vpop.eup %5299 }
 0x3c6   : > { %v5302_v39 = vpop.eup %5301  ;;  %5311 = vrcp.f32 %v3536_v44  ;;  %v3538_v53 = vadd.f32 1.0, %v5300_v3  ;;  %v5333_v3 = vld [vmem:[%s5402_s23 + $0xa8] sm:$0xff] }
 0x3c7   : > { %3741 = vperm.xlu0 %5186, %v5298_v63  }
 0x3c8   : > { %5313 = vrcp.f32 %v3538_v53  ;;  %v5334_v53 = vld [vmem:[%s5402_s23 + $0x80] sm:$0xff] }
 0x3c9   : > { %v5304_v58 = vpop.eup %5303  ;;  %3716 = vperm.xlu1 %5185, %v5302_v39  }
 0x3ca   : > { %v5306_v11 = vpop.eup %5305 }
 0x3cb   : > { %3751 = vperm.xlu0 %5186, %v5304_v58  }
 0x3cd   : > { %v5308_v18 = vpop.eup %5307  ;;  %3726 = vperm.xlu1 %5185, %v5306_v11  }
 0x3ce   : > { %v5310_v30 = vpop.eup %5309 }
 0x3cf   : > { %3761 = vperm.xlu0 %5186, %v5308_v18  }
 0x3d0   : > { %v5312_v12 = vpop.eup %5311 }
 0x3d1   : > { %3736 = vperm.xlu1 %5185, %v5310_v30   ;;  %v5335_v30 = vld [vmem:[%s5402_s23 + $0xb8] sm:$0xff] }
 0x3d2   : > { %v5314_v51 = vpop.eup %5313 }
 0x3d5   : > { %3746 = vperm.xlu1 %5185, %v5312_v12  }
 0x3d9   : > { %3756 = vperm.xlu1 %5185, %v5314_v51  }
 0x410   : > { %v3612_v54 = vpop.permute.xlu1 %3611 }
 0x411   : > { %v3765_v55 = vmul.f32 %v5315_v6, %v3612_v54  ;;  %v3607_v38 = vpop.permute.xlu0 %3606  ;;  %v5336_v54 = vld [vmem:[%s5402_s23 + $0x90] sm:$0xff] }
 0x412   : > { %v3764_v9 = vmul.f32 %v5316_v56, %v3607_v38  ;;  %v5337_v38 = vld [vmem:[%s5402_s23 + $0xc8] sm:$0xff] }
 0x413   : > { %3797 = vst.msk [vmem:[%s6599_s6 + $0x8] sm:$0xff] %vm257_vm0, %v3765_v55 }
 0x414   : > { %3796 = vst.msk [vmem:[%s6599_s6] sm:$0xff] %vm257_vm0, %v3764_v9  ;;  %v3622_v43 = vpop.permute.xlu1 %3621 }
 0x415   : > { %v3767_v40 = vmul.f32 %v5317_v10, %v3622_v43  ;;  %v5338_v43 = vld [vmem:[%s5402_s23 + $0xa0] sm:$0xff] }
 0x417   : > { %3799 = vst.msk [vmem:[%s6599_s6 + $0x18] sm:$0xff] %vm257_vm0, %v3767_v40 }
 0x418   : > { %v3617_v61 = vpop.permute.xlu1 %3616 }
 0x419   : > { %v3766_v46 = vmul.f32 %v5318_v34, %v3617_v61  ;;  %v5339_v61 = vld [vmem:[%s5402_s23 + $0xd8] sm:$0xff] }
 0x41b   : > { %3798 = vst.msk [vmem:[%s6599_s6 + $0x10] sm:$0xff] %vm257_vm0, %v3766_v46 }
 0x41c   : > { %v3632_v21 = vpop.permute.xlu1 %3631 }
 0x41d   : > { %v3769_v36 = vmul.f32 %v5319_v59, %v3632_v21  ;;  %v5340_v21 = vld [vmem:[%s5402_s23 + $0xb0] sm:$0xff] }
 0x41f   : > { %3801 = vst.msk [vmem:[%s6599_s6 + $0x28] sm:$0xff] %vm257_vm0, %v3769_v36 }
 0x420   : > { %v3627_v2 = vpop.permute.xlu1 %3626  ;;  %v3652_v32 = vpop.permute.xlu0 %3651 }
 0x421   : > { %v3768_v49 = vmul.f32 %v5320_v50, %v3627_v2  ;;  %v3773_v0 = vmul.f32 %v5321_v52, %v3652_v32  ;;  %v5341_v2 = vld [vmem:[%s5402_s23 + $0xe8] sm:$0xff] }
 0x423   : > { %3800 = vst.msk [vmem:[%s6599_s6 + $0x20] sm:$0xff] %vm257_vm0, %v3768_v49  ;;  %3805 = vst.msk [vmem:[%s6599_s6 + $0x48] sm:$0xff] %vm257_vm0, %v3773_v0  ;;  %v5342_v49 = vld [vmem:[%s5402_s23 + $0xc0] sm:$0xff] }
 0x424   : > { %v3642_v37 = vpop.permute.xlu1 %3641  ;;  %v3662_v16 = vpop.permute.xlu0 %3661 }
 0x425   : > { %v3771_v28 = vmul.f32 %v5322_v57, %v3642_v37  ;;  %v3775_v24 = vmul.f32 %v5323_v1, %v3662_v16  ;;  %v5343_v37 = vld [vmem:[%s5402_s23 + $0xf8] sm:$0xff] }
 0x427   : > { %3803 = vst.msk [vmem:[%s6599_s6 + $0x38] sm:$0xff] %vm257_vm0, %v3771_v28  ;;  %3807 = vst.msk [vmem:[%s6599_s6 + $0x58] sm:$0xff] %vm257_vm0, %v3775_v24  ;;  %v5344_v28 = vld [vmem:[%s5402_s23 + $0xd0] sm:$0xff] }
 0x428   : > { %v3637_v60 = vpop.permute.xlu1 %3636  ;;  %v3672_v27 = vpop.permute.xlu0 %3671 }
 0x429   : > { %v3770_v13 = vmul.f32 %v5324_v14, %v3637_v60  ;;  %v3777_v23 = vmul.f32 %v5325_v48, %v3672_v27  ;;  %v5345_v60 = vld [vmem:[%s5402_s23 + $0xe0] sm:$0xff] }
 0x42b   : > { %3802 = vst.msk [vmem:[%s6599_s6 + $0x30] sm:$0xff] %vm257_vm0, %v3770_v13  ;;  %3809 = vst.msk [vmem:[%s6599_s6 + $0x68] sm:$0xff] %vm257_vm0, %v3777_v23  ;;  %v5346_v13 = vld [vmem:[%s5402_s23 + $0xf0] sm:$0xff] }
 0x42c   : > { %v3647_v17 = vpop.permute.xlu1 %3646 }
 0x42d   : > { %v3772_v15 = vmul.f32 %v5326_v45, %v3647_v17 }
 0x42e   : > { %v3682_v41 = vpop.permute.xlu0 %3681 }
 0x42f   : > { %3804 = vst.msk [vmem:[%s6599_s6 + $0x40] sm:$0xff] %vm257_vm0, %v3772_v15  ;;  %v3779_v29 = vmul.f32 %v5327_v22, %v3682_v41 }
 0x430   : > { %v3657_v26 = vpop.permute.xlu1 %3656 }
 0x431   : > { %3811 = vst.msk [vmem:[%s6599_s6 + $0x78] sm:$0xff] %vm257_vm0, %v3779_v29  ;;  %v3774_v31 = vmul.f32 %v5328_v47, %v3657_v26 }
 0x432   : > { %v3692_v35 = vpop.permute.xlu0 %3691 }
 0x433   : > { %3806 = vst.msk [vmem:[%s6599_s6 + $0x50] sm:$0xff] %vm257_vm0, %v3774_v31  ;;  %v3781_v5 = vmul.f32 %v5329_v4, %v3692_v35 }
 0x434   : > { %v3667_v62 = vpop.permute.xlu1 %3666 }
 0x435   : > { %3813 = vst.msk [vmem:[%s6599_s6 + $0x88] sm:$0xff] %vm257_vm0, %v3781_v5  ;;  %v3776_v25 = vmul.f32 %v5330_v19, %v3667_v62 }
 0x436   : > { %v3702_v20 = vpop.permute.xlu0 %3701 }
 0x437   : > { %3808 = vst.msk [vmem:[%s6599_s6 + $0x60] sm:$0xff] %vm257_vm0, %v3776_v25  ;;  %v3783_v42 = vmul.f32 %v5331_v8, %v3702_v20 }
 0x438   : > { %v3677_v33 = vpop.permute.xlu1 %3676 }
 0x439   : > { %3815 = vst.msk [vmem:[%s6599_s6 + $0x98] sm:$0xff] %vm257_vm0, %v3783_v42  ;;  %v3778_v63 = vmul.f32 %v5332_v7, %v3677_v33 }
 0x43a   : > { %v3712_v44 = vpop.permute.xlu0 %3711 }
 0x43b   : > { %3810 = vst.msk [vmem:[%s6599_s6 + $0x70] sm:$0xff] %vm257_vm0, %v3778_v63  ;;  %v3785_v39 = vmul.f32 %v5333_v3, %v3712_v44 }
 0x43c   : > { %v3687_v58 = vpop.permute.xlu1 %3686 }
 0x43d   : > { %3817 = vst.msk [vmem:[%s6599_s6 + $0xa8] sm:$0xff] %vm257_vm0, %v3785_v39  ;;  %v3780_v11 = vmul.f32 %v5334_v53, %v3687_v58 }
 0x43e   : > { %v3722_v18 = vpop.permute.xlu0 %3721 }
 0x43f   : > { %3812 = vst.msk [vmem:[%s6599_s6 + $0x80] sm:$0xff] %vm257_vm0, %v3780_v11  ;;  %v3787_v12 = vmul.f32 %v5335_v30, %v3722_v18 }
 0x440   : > { %v3697_v51 = vpop.permute.xlu1 %3696 }
 0x441   : > { %3819 = vst.msk [vmem:[%s6599_s6 + $0xb8] sm:$0xff] %vm257_vm0, %v3787_v12  ;;  %v3782_v6 = vmul.f32 %v5336_v54, %v3697_v51 }
 0x442   : > { %v3732_v55 = vpop.permute.xlu0 %3731 }
 0x443   : > { %3814 = vst.msk [vmem:[%s6599_s6 + $0x90] sm:$0xff] %vm257_vm0, %v3782_v6  ;;  %v3789_v56 = vmul.f32 %v5337_v38, %v3732_v55 }
 0x444   : > { %v3707_v9 = vpop.permute.xlu1 %3706 }
 0x445   : > { %3821 = vst.msk [vmem:[%s6599_s6 + $0xc8] sm:$0xff] %vm257_vm0, %v3789_v56  ;;  %v3784_v10 = vmul.f32 %v5338_v43, %v3707_v9 }
 0x446   : > { %v3742_v40 = vpop.permute.xlu0 %3741 }
 0x447   : > { %3816 = vst.msk [vmem:[%s6599_s6 + $0xa0] sm:$0xff] %vm257_vm0, %v3784_v10  ;;  %v3791_v34 = vmul.f32 %v5339_v61, %v3742_v40 }
 0x448   : > { %v3717_v46 = vpop.permute.xlu1 %3716 }
 0x449   : > { %3823 = vst.msk [vmem:[%s6599_s6 + $0xd8] sm:$0xff] %vm257_vm0, %v3791_v34  ;;  %v3786_v59 = vmul.f32 %v5340_v21, %v3717_v46 }
 0x44a   : > { %v3752_v36 = vpop.permute.xlu0 %3751 }
 0x44b   : > { %3818 = vst.msk [vmem:[%s6599_s6 + $0xb0] sm:$0xff] %vm257_vm0, %v3786_v59  ;;  %v3793_v32 = vmul.f32 %v5341_v2, %v3752_v36 }
 0x44c   : > { %v3727_v50 = vpop.permute.xlu1 %3726 }
 0x44d   : > { %3825 = vst.msk [vmem:[%s6599_s6 + $0xe8] sm:$0xff] %vm257_vm0, %v3793_v32  ;;  %v3788_v52 = vmul.f32 %v5342_v49, %v3727_v50 }
 0x44e   : > { %v3762_v0 = vpop.permute.xlu0 %3761 }
 0x44f   : > { %3820 = vst.msk [vmem:[%s6599_s6 + $0xc0] sm:$0xff] %vm257_vm0, %v3788_v52  ;;  %v3795_v16 = vmul.f32 %v5343_v37, %v3762_v0 }
 0x450   : > { %v3737_v57 = vpop.permute.xlu1 %3736 }
 0x451   : > { %3827 = vst.msk [vmem:[%s6599_s6 + $0xf8] sm:$0xff] %vm257_vm0, %v3795_v16  ;;  %v3790_v1 = vmul.f32 %v5344_v28, %v3737_v57 }
 0x453   : > { %3822 = vst.msk [vmem:[%s6599_s6 + $0xd0] sm:$0xff] %vm257_vm0, %v3790_v1 }
 0x454   : > { %v3747_v24 = vpop.permute.xlu1 %3746 }
 0x455   : > { %v3792_v27 = vmul.f32 %v5345_v60, %v3747_v24 }
 0x457   : > { %3824 = vst.msk [vmem:[%s6599_s6 + $0xe0] sm:$0xff] %vm257_vm0, %v3792_v27 }
 0x458   : > { %v3757_v14 = vpop.permute.xlu1 %3756 }
 0x459   : > { %v3794_v48 = vmul.f32 %v5346_v13, %v3757_v14 }
 0x45b   : > { %3826 = vst.msk [vmem:[%s6599_s6 + $0xf0] sm:$0xff] %vm257_vm0, %v3794_v48 }
 0x45c PF: > { %s15_s18 = sadd.s32 1, %s5353_s18  }
 0x45d   : > { %p12_p4 = scmp.ge.s32.totalorder %s15_s18, 4  }
 0x45f   :  { %14 = sbr.rel (!%p12_p4) target bundleno = 1 (0x1), region = 70 }

</bundles_post_ra>
